<compile_context>
chip_gen: v6e
topology: v6e:2x2x1
jax: 0.10.0
libtpu: 0.0.40
codegen_flags: <defaults>
</compile_context>

<pallas_src>
import jax
import jax.numpy as jnp
from jax.experimental import pallas as pl
from jax.experimental.pallas import tpu as pltpu


def _round_up(x, m):
    return ((x + m - 1) // m) * m


def _vmem_capacity_bytes():
    """Physical VMEM of the local TPU generation (falls back to v7x's 64 MiB)."""
    try:
        cap = getattr(pltpu.get_tpu_info(), "vmem_capacity_bytes", None)
        if cap:
            return int(cap)
    except Exception:
        pass
    return 64 << 20


def _choose_tiles(B, D, K, emb_itemsize, mm_itemsize, vmem_budget, k_tile=None):
    """Pick (batch tile, K tile, padded K, emb buffer count, est. VMEM bytes)."""
    kp0 = _round_up(K, 128)
    # The resident (single-buffered) centroid slab gets at most ~1/3 of the
    # budget; past that we tile K and carry a running max/argmax across tiles.
    slab_cap = max(vmem_budget // 3, 128 * D * mm_itemsize)
    if k_tile is not None:
        kt = max(128, _round_up(int(k_tile), 128))
    elif D * kp0 * mm_itemsize > slab_cap:
        kt = max(128, (slab_cap // max(D * mm_itemsize, 1)) // 128 * 128)
    else:
        kt = kp0
    kt = min(kt, kp0)
    kp = _round_up(K, kt)                        # kt always divides kp
    nk = kp // kt

    resident_bufs = 1 if nk == 1 else 2          # Buffered(1) only when truly resident
    resident = resident_bufs * (kt * D * mm_itemsize + 8 * kt * 4)

    def per_row(nbuf):
        # streamed embedding buffers + in-kernel f32/bf16 casts of the tile
        # + ~4 (tb, kt) f32 intermediates + output/scratch slack
        return nbuf * D * emb_itemsize + 6 * D + 16 * kt + 256

    remaining = max(vmem_budget - resident, 0)
    tb = (remaining // per_row(2)) // 128 * 128
    tb = max(128, min(tb, 2048))
    # >=2 batch-grid steps so both v7x TensorCores get work; never bigger than
    # the (128-rounded) batch itself.
    tb = min(tb, _round_up(pl.cdiv(max(B, 1), 2), 128), _round_up(max(B, 1), 128))

    emb_bufs = 2
    if nk == 1 and resident + tb * per_row(3) <= vmem_budget:
        emb_bufs = 3                             # deeper pipeline on the streamed operand
    est = resident + tb * per_row(emb_bufs) + (4 << 20)
    return tb, kt, kp, emb_bufs, est


def _kmeans_criterion_kernel(emb_ref, cdk_ref, c2_ref, maxd_ref, assign_ref,
                             m_sc, a_sc):
    j = pl.program_id(1)                         # K-tile index ("arbitrary" axis)

    @pl.when(j == 0)
    def _():
        m_sc[...] = jnp.full_like(m_sc, -jnp.inf)
        a_sc[...] = jnp.zeros_like(a_sc)

    e = emb_ref[...]                                     # (TB, D), input dtype
    c_dk = cdk_ref[...]                                  # (D, KT) = -2 * centroids.T
    # MXU cross term in the matmul dtype (bf16 by default), f32 accumulation.
    cross = jnp.dot(e.astype(c_dk.dtype), c_dk,
                    preferred_element_type=jnp.float32)  # (TB, KT) = -2 e.c
    partial = cross + c2_ref[...]                        # + ||c||^2 (-inf in padded cols)

    kt = partial.shape[1]
    tmax = jnp.max(partial, axis=1, keepdims=True)       # (TB, 1)
    iota = jax.lax.broadcasted_iota(jnp.int32, partial.shape, 1)
    targ = jnp.min(jnp.where(partial >= tmax, iota, kt),
                   axis=1, keepdims=True) + j * kt       # first-occurrence, global idx

    better = tmax > m_sc[...]                            # strict >: keep earlier ties
    a_sc[...] = jnp.where(better, targ, a_sc[...])
    m_sc[...] = jnp.where(better, tmax, m_sc[...])

    @pl.when(j == pl.num_programs(1) - 1)
    def _():
        e32 = e.astype(jnp.float32)
        e2 = jnp.sum(e32 * e32, axis=1, keepdims=True)   # (TB, 1), exact f32
        maxd_ref[...] = (e2 + m_sc[...])[:, 0][None, :]  # (1, TB) lane-dense
        assign_ref[...] = a_sc[...][:, 0][None, :]       # (1, TB) lane-dense


def kmeans_criterion(embeddings, centroids, lmbda, *,
                     precision="bfloat16", k_tile=None):
    """Pallas implementation of KMeansCriterion.forward.

    embeddings: (B, D) float array  (streamed from HBM untouched)
    centroids : (K, D) float array
    precision : "bfloat16" (MXU-native cross term, f32 accumulation) or "float32"
    k_tile    : optional centroid-tile-width override (multiple of 128)
    returns (loss: f32 scalar, cluster_assignments: (B,) int32)
    """
    B, D = embeddings.shape
    K, Dc = centroids.shape
    assert D == Dc
    mm_dtype = jnp.bfloat16 if precision == "bfloat16" else jnp.float32
    emb_itemsize = jnp.dtype(embeddings.dtype).itemsize
    mm_itemsize = jnp.dtype(mm_dtype).itemsize

    cap = _vmem_capacity_bytes()
    budget = cap * 11 // 16                      # ~88 MiB v5e/v6e, ~44 MiB v7x
    tb, kt, kp, emb_bufs, est_vmem = _choose_tiles(
        B, D, K, emb_itemsize, mm_itemsize, budget, k_tile)
    nb, nk = pl.cdiv(B, tb), kp // kt
    b_out = nb * tb                              # only the tiny outputs are padded

    # One-time prep on the small (K, D) centroid array; the big (B, D)
    # embeddings are NOT padded or cast in the wrapper (no extra HBM traffic).
    cen = centroids.astype(jnp.float32)
    c_dk = jnp.pad(-2.0 * cen, ((0, kp - K), (0, 0))).T.astype(mm_dtype)   # (D, kp)
    c2 = jnp.pad(jnp.sum(cen * cen, axis=1), (0, kp - K),
                 constant_values=-jnp.inf)[None, :].astype(jnp.float32)    # (1, kp)

    cost = pl.CostEstimate(
        flops=2 * B * kp * D,
        bytes_accessed=B * D * emb_itemsize + D * kp * mm_itemsize + kp * 4 + 2 * B * 4,
        transcendentals=0,
    )

    def build(use_pipeline_mode):
        def in_spec(shape, index_map, bufs):
            if use_pipeline_mode and bufs is not None:
                return pl.BlockSpec(shape, index_map, pipeline_mode=pl.Buffered(bufs))
            return pl.BlockSpec(shape, index_map)

        grid_spec = pltpu.PrefetchScalarGridSpec(
            num_scalar_prefetch=0,
            grid=(nb, nk),
            in_specs=[
                # Streamed batch tiles (ragged last tile handled by Pallas).
                in_spec((tb, D), lambda i, j: (i, 0), emb_bufs),
                # Centroids / ||c||^2: single-buffered when fully resident.
                in_spec((D, kt), lambda i, j: (0, j), 1 if nk == 1 else None),
                in_spec((1, kt), lambda i, j: (0, j), 1 if nk == 1 else None),
            ],
            out_specs=[
                pl.BlockSpec((1, tb), lambda i, j: (0, i)),   # max distances
                pl.BlockSpec((1, tb), lambda i, j: (0, i)),   # assignments
            ],
            scratch_shapes=[
                pltpu.VMEM((tb, 1), jnp.float32),             # running max
                pltpu.VMEM((tb, 1), jnp.int32),               # running argmax
            ],
        )
        return pl.pallas_call(
            _kmeans_criterion_kernel,
            out_shape=(jax.ShapeDtypeStruct((1, b_out), jnp.float32),
                       jax.ShapeDtypeStruct((1, b_out), jnp.int32)),
            grid_spec=grid_spec,
            compiler_params=pltpu.CompilerParams(
                dimension_semantics=("parallel", "arbitrary"),
                vmem_limit_bytes=min(max(est_vmem, 16 << 20), cap * 9 // 10),
            ),
            cost_estimate=cost,
        )

    try:
        maxd, assign = build(True)(embeddings, c_dk, c2)
    except Exception:
        # Fallback for JAX versions without BlockSpec(pipeline_mode=...).
        maxd, assign = build(False)(embeddings, c_dk, c2)

    # lmbda and the reduction stay outside the kernel: no recompile when lmbda
    # changes, and no cross-grid-step accumulator (batch axis stays parallel).
    loss = jnp.float32(lmbda) * jnp.sum(maxd[0, :B])
    return loss, assign[0, :B]


def _reference(embeddings, centroids, lmbda):
    # Pure-JAX reference mirroring the PyTorch code literally.
    dist = jnp.sum((embeddings[:, None, :] - centroids[None, :, :]) ** 2, axis=2)
    return lmbda * jnp.sum(jnp.max(dist, axis=1)), jnp.argmax(dist, axis=1), dist


if __name__ == "__main__":
    key = jax.random.PRNGKey(0)
    k_emb, k_cen, k_emb2, k_cen2 = jax.random.split(key, 4)

    # Shapes implied by the module: Encoder -> ReLU'd (batch, d) embeddings,
    # centroids (k, d).  Small demo: batch=8, k=16, d=32.
    B, K, D = 8, 16, 32
    lmbda = 0.5
    embeddings = jax.nn.relu(jax.random.normal(k_emb, (B, D), dtype=jnp.float32))
    centroids = jax.random.normal(k_cen, (K, D), dtype=jnp.float32)
    ref_loss, ref_assign, ref_dist = _reference(embeddings, centroids, lmbda)
    ref_max = jnp.max(ref_dist, axis=1)

    # 1) Default bf16-MXU path: loss to bf16 tolerance; assignments must match
    #    except where the reference distances are themselves a near-tie.
    loss, assign = kmeans_criterion(embeddings, centroids, lmbda)
    jax.block_until_ready(loss)
    jax.block_until_ready(assign)
    assert jnp.allclose(loss, ref_loss, rtol=2e-2, atol=1e-2), (loss, ref_loss)
    picked = ref_dist[jnp.arange(B), assign]
    near_tie = picked >= ref_max - (1e-2 * jnp.abs(ref_max) + 1e-3)
    assert bool(jnp.all((assign == ref_assign.astype(jnp.int32)) | near_tie)), (
        assign, ref_assign)

    # 2) f32 path: exact assignments, tight loss tolerance.
    loss32, assign32 = kmeans_criterion(embeddings, centroids, lmbda,
                                        precision="float32")
    jax.block_until_ready(loss32)
    assert jnp.allclose(loss32, ref_loss, rtol=1e-4, atol=1e-3), (loss32, ref_loss)
    assert jnp.array_equal(assign32, ref_assign.astype(jnp.int32)), (assign32, ref_assign)

    # 3) Ragged batch + K-tiled path (multi-step "parallel" batch grid, running
    #    max/argmax carried across the "arbitrary" K axis).
    b3, k3, d3, lmbda3 = 300, 256, 64, 0.25
    emb3 = jax.nn.relu(jax.random.normal(k_emb2, (b3, d3), dtype=jnp.float32))
    cen3 = jax.random.normal(k_cen2, (k3, d3), dtype=jnp.float32)
    ref_loss3, ref_assign3, ref_dist3 = _reference(emb3, cen3, lmbda3)
    loss3, assign3 = kmeans_criterion(emb3, cen3, lmbda3,
                                      precision="float32", k_tile=128)
    jax.block_until_ready(loss3)
    assert jnp.allclose(loss3, ref_loss3, rtol=1e-4, atol=1e-2), (loss3, ref_loss3)
    ref_max3 = jnp.max(ref_dist3, axis=1)
    picked3 = ref_dist3[jnp.arange(b3), assign3]
    near3 = picked3 >= ref_max3 - (1e-5 * jnp.abs(ref_max3) + 1e-3)
    assert bool(jnp.all((assign3 == ref_assign3.astype(jnp.int32)) | near3)), (
        assign3, ref_assign3)

    print("KERNEL_OK")
</pallas_src>

<mosaic_0001>
module attributes {stable_mosaic.version = 11 : i64} {
  func.func @_kmeans_criterion_kernel(%arg0: i32, %arg1: i32, %arg2: memref<128x32xf32, #tpu.memory_space<vmem>>, %arg3: memref<32x128xbf16, #tpu.memory_space<vmem>>, %arg4: memref<1x128xf32, #tpu.memory_space<vmem>>, %arg5: memref<1x128xf32, #tpu.memory_space<vmem>>, %arg6: memref<1x128xi32, #tpu.memory_space<vmem>>, %arg7: memref<128x1xf32, #tpu.memory_space<vmem>>, %arg8: memref<128x1xi32, #tpu.memory_space<vmem>>) attributes {dimension_semantics = [#tpu.dimension_semantics<parallel>, #tpu.dimension_semantics<arbitrary>], iteration_bounds = array<i64: 1, 1>, scalar_prefetch = 0 : i64, scratch_operands = 2 : i64, tpu.core_type = #tpu.core_type<tc>, window_params = [{transform_indices = @transform_0, window_bounds = array<i64: 128, 32>}, {transform_indices = @transform_1, window_bounds = array<i64: 32, 128>}, {transform_indices = @transform_2, window_bounds = array<i64: 1, 128>}, {transform_indices = @transform_3, window_bounds = array<i64: 1, 128>}, {transform_indices = @transform_4, window_bounds = array<i64: 1, 128>}]} {
    %c0_i32 = arith.constant 0 : i32
    %0 = arith.cmpi eq, %arg1, %c0_i32 : i32
    %1 = arith.extui %0 : i1 to i32
    %c0_i32_0 = arith.constant 0 : i32
    %2 = arith.cmpi ne, %1, %c0_i32_0 : i32
    scf.if %2 {
      %cst_21 = arith.constant 0xFF800000 : f32
      %33 = vector.broadcast %cst_21 : f32 to vector<128x1xf32>
      %c0_22 = arith.constant 0 : index
      %c0_23 = arith.constant 0 : index
      %34 = vector.load %arg7[%c0_22, %c0_23] : memref<128x1xf32, #tpu.memory_space<vmem>>, vector<128x1xf32>
      tpu.vector_store %arg7[%c0_22, %c0_23], %33 {strides = array<i32>} : memref<128x1xf32, #tpu.memory_space<vmem>>, vector<128x1xf32>,
      %c0_i32_24 = arith.constant 0 : i32
      %35 = vector.broadcast %c0_i32_24 : i32 to vector<128x1xi32>
      %c0_25 = arith.constant 0 : index
      %c0_26 = arith.constant 0 : index
      %36 = vector.load %arg8[%c0_25, %c0_26] : memref<128x1xi32, #tpu.memory_space<vmem>>, vector<128x1xi32>
      tpu.vector_store %arg8[%c0_25, %c0_26], %35 {strides = array<i32>} : memref<128x1xi32, #tpu.memory_space<vmem>>, vector<128x1xi32>,
    } else {
    }
    %c0 = arith.constant 0 : index
    %c0_1 = arith.constant 0 : index
    %3 = vector.load %arg2[%c0, %c0_1] : memref<128x32xf32, #tpu.memory_space<vmem>>, vector<128x32xf32>
    %c0_2 = arith.constant 0 : index
    %c0_3 = arith.constant 0 : index
    %4 = vector.load %arg3[%c0_2, %c0_3] : memref<32x128xbf16, #tpu.memory_space<vmem>>, vector<32x128xbf16>
    %5 = arith.truncf %3 : vector<128x32xf32> to vector<128x32xbf16>
    %cst = arith.constant dense<0.000000e+00> : vector<128x128xf32>
    %6 = tpu.matmul %5, %4, %cst {dimension_numbers = #tpu.dot_dimension_numbers<[1], [0], [0], [1], [0, 0, 1, 1], [], []>} : vector<128x32xbf16>, vector<32x128xbf16>, vector<128x128xf32> -> vector<128x128xf32>
    %c0_4 = arith.constant 0 : index
    %c0_5 = arith.constant 0 : index
    %7 = vector.load %arg4[%c0_4, %c0_5] : memref<1x128xf32, #tpu.memory_space<vmem>>, vector<1x128xf32>
    %8 = vector.broadcast %7 : vector<1x128xf32> to vector<128x128xf32>
    %9 = arith.addf %6, %8 : vector<128x128xf32>
    %cst_6 = arith.constant dense<0xFF800000> : vector<128xf32>
    %10 = vector.multi_reduction <maximumf>, %9, %cst_6 [1] : vector<128x128xf32> to vector<128xf32>
    %11 = vector.shape_cast %10 : vector<128xf32> to vector<128x1xf32>
    %12 = tpu.iota {dimensions = array<i32: 1>} : vector<128x128xi32>
    %13 = vector.broadcast %11 : vector<128x1xf32> to vector<128x128xf32>
    %14 = arith.cmpf oge, %9, %13 : vector<128x128xf32>
    %c128_i32 = arith.constant 128 : i32
    %15 = vector.broadcast %c128_i32 : i32 to vector<128x128xi32>
    %16 = arith.select %14, %12, %15 : vector<128x128xi1>, vector<128x128xi32>
    %cst_7 = arith.constant dense<2147483647> : vector<128xi32>
    %17 = vector.multi_reduction <minsi>, %16, %cst_7 [1] : vector<128x128xi32> to vector<128xi32>
    %18 = vector.shape_cast %17 : vector<128xi32> to vector<128x1xi32>
    %c128_i32_8 = arith.constant 128 : i32
    %19 = arith.muli %arg1, %c128_i32_8 : i32
    %20 = vector.broadcast %19 : i32 to vector<128x1xi32>
    %21 = arith.addi %18, %20 : vector<128x1xi32>
    %c0_9 = arith.constant 0 : index
    %c0_10 = arith.constant 0 : index
    %22 = vector.load %arg7[%c0_9, %c0_10] : memref<128x1xf32, #tpu.memory_space<vmem>>, vector<128x1xf32>
    %23 = arith.cmpf ogt, %11, %22 : vector<128x1xf32>
    %c0_11 = arith.constant 0 : index
    %c0_12 = arith.constant 0 : index
    %24 = vector.load %arg8[%c0_11, %c0_12] : memref<128x1xi32, #tpu.memory_space<vmem>>, vector<128x1xi32>
    %25 = arith.select %23, %21, %24 : vector<128x1xi1>, vector<128x1xi32>
    %c0_13 = arith.constant 0 : index
    %c0_14 = arith.constant 0 : index
    %26 = vector.load %arg8[%c0_13, %c0_14] : memref<128x1xi32, #tpu.memory_space<vmem>>, vector<128x1xi32>
    tpu.vector_store %arg8[%c0_13, %c0_14], %25 {strides = array<i32>} : memref<128x1xi32, #tpu.memory_space<vmem>>, vector<128x1xi32>,
    %c0_15 = arith.constant 0 : index
    %c0_16 = arith.constant 0 : index
    %27 = vector.load %arg7[%c0_15, %c0_16] : memref<128x1xf32, #tpu.memory_space<vmem>>, vector<128x1xf32>
    %28 = arith.select %23, %11, %27 : vector<128x1xi1>, vector<128x1xf32>
    %c0_17 = arith.constant 0 : index
    %c0_18 = arith.constant 0 : index
    %29 = vector.load %arg7[%c0_17, %c0_18] : memref<128x1xf32, #tpu.memory_space<vmem>>, vector<128x1xf32>
    tpu.vector_store %arg7[%c0_17, %c0_18], %28 {strides = array<i32>} : memref<128x1xf32, #tpu.memory_space<vmem>>, vector<128x1xf32>,
    %c0_i32_19 = arith.constant 0 : i32
    %30 = arith.cmpi eq, %arg1, %c0_i32_19 : i32
    %31 = arith.extui %30 : i1 to i32
    %c0_i32_20 = arith.constant 0 : i32
    %32 = arith.cmpi ne, %31, %c0_i32_20 : i32
    scf.if %32 {
      %33 = arith.mulf %3, %3 : vector<128x32xf32>
      %cst_21 = arith.constant dense<0.000000e+00> : vector<128xf32>
      %34 = vector.multi_reduction <add>, %33, %cst_21 [1] : vector<128x32xf32> to vector<128xf32>
      %35 = vector.shape_cast %34 : vector<128xf32> to vector<128x1xf32>
      %c0_22 = arith.constant 0 : index
      %c0_23 = arith.constant 0 : index
      %36 = vector.load %arg7[%c0_22, %c0_23] : memref<128x1xf32, #tpu.memory_space<vmem>>, vector<128x1xf32>
      %37 = arith.addf %35, %36 : vector<128x1xf32>
      %38 = vector.shape_cast %37 : vector<128x1xf32> to vector<128xf32>
      %39 = vector.shape_cast %38 : vector<128xf32> to vector<1x128xf32>
      %c0_24 = arith.constant 0 : index
      %c0_25 = arith.constant 0 : index
      %40 = vector.load %arg5[%c0_24, %c0_25] : memref<1x128xf32, #tpu.memory_space<vmem>>, vector<1x128xf32>
      tpu.vector_store %arg5[%c0_24, %c0_25], %39 {strides = array<i32>} : memref<1x128xf32, #tpu.memory_space<vmem>>, vector<1x128xf32>,
      %c0_26 = arith.constant 0 : index
      %c0_27 = arith.constant 0 : index
      %41 = vector.load %arg8[%c0_26, %c0_27] : memref<128x1xi32, #tpu.memory_space<vmem>>, vector<128x1xi32>
      %42 = vector.shape_cast %41 : vector<128x1xi32> to vector<128xi32>
      %43 = vector.shape_cast %42 : vector<128xi32> to vector<1x128xi32>
      %c0_28 = arith.constant 0 : index
      %c0_29 = arith.constant 0 : index
      %44 = vector.load %arg6[%c0_28, %c0_29] : memref<1x128xi32, #tpu.memory_space<vmem>>, vector<1x128xi32>
      tpu.vector_store %arg6[%c0_28, %c0_29], %43 {strides = array<i32>} : memref<1x128xi32, #tpu.memory_space<vmem>>, vector<1x128xi32>,
    } else {
    }
    return
  }
  func.func @transform_0(%arg0: i32, %arg1: i32) -> (i32, i32) {
    %c0_i32 = arith.constant 0 : i32
    %c0_i32_0 = arith.constant 0 : i32
    return %arg0, %c0_i32 : i32, i32
  }
  func.func @transform_1(%arg0: i32, %arg1: i32) -> (i32, i32) {
    %c0_i32 = arith.constant 0 : i32
    %c0_i32_0 = arith.constant 0 : i32
    return %c0_i32, %arg1 : i32, i32
  }
  func.func @transform_2(%arg0: i32, %arg1: i32) -> (i32, i32) {
    %c0_i32 = arith.constant 0 : i32
    %c0_i32_0 = arith.constant 0 : i32
    return %c0_i32, %arg1 : i32, i32
  }
  func.func @transform_3(%arg0: i32, %arg1: i32) -> (i32, i32) {
    %c0_i32 = arith.constant 0 : i32
    %c0_i32_0 = arith.constant 0 : i32
    return %c0_i32, %arg0 : i32, i32
  }
  func.func @transform_4(%arg0: i32, %arg1: i32) -> (i32, i32) {
    %c0_i32 = arith.constant 0 : i32
    %c0_i32_0 = arith.constant 0 : i32
    return %c0_i32, %arg0 : i32, i32
  }
}

</mosaic_0001>

<bundles_post_ra>
// kernel: tpu_custom_call.1
= control target key start
LH: loop header
LB: loop body
LE: loop exit
PB: predicated region body
PF: predicated region fallthrough
CT: control target
= control target key end

     0   :  { %10 = vsyncpa [#allocation5], 0  ;;  %s2174_s0 = inlined_call_operand.hbm [shape: f32[8,32], index: 0, kind: input, shape index: {}]   ;;  %s2175_s1 = inlined_call_operand.hbm [shape: bf16[32,128], index: 1, kind: input, shape index: {}]   ;;  %s2176_s2 = inlined_call_operand.vmem [shape: f32[1,128], index: 2, kind: input, shape index: {}]   ;;  %s2177_s3 = inlined_call_operand.hbm [shape: f32[1,128], index: 3, kind: output, shape index: {0}]   ;;  %s2178_s4 = inlined_call_operand.hbm [shape: s32[1,128], index: 4, kind: output, shape index: {1}]  }
   0x1   :  { %11 = vsyncpa [#allocation8], 0 }
   0x2   :  { %12 = vsyncpa [#allocation6], 0 }
   0x3   :  { %13 = vsyncpa [#allocation11], 0 }
   0x4   :  { %18 = vsyncadd [#allocation5], 1920  ;;  %s1285_s15 = smov [#allocation4]  }
   0x5   :  { %s19_s16 = sshll.u32 %s1285_s15, 4  ;;  %s20_s16 = int_to_ptr.vmem [resolvable:$true] %s19_s16 }
   0x6   :  { %s1205_s17 = scalar_lea.vmem %s20_s16, 128  ;;  %s1209_s18 = scalar_lea.vmem %s20_s16, 2048 }
   0x7   :  { %p1206_p0 = scmp.ne.s32.totalorder %s20_s16, %s1205_s17  ;;  %p1210_p1 = scmp.lt.s32.totalorder %s20_s16, %s20_s16 }
   0x8   :  { %p1211_p2 = scmp.lt.s32.totalorder %s1209_s18, %s1205_s17 }
   0xa   :  { %p1212_p3 = por %p1211_p2, %p1210_p1 }
   0xc   :  { %p1213_p4 = pnand %p1212_p3, %p1206_p0 }
   0xe   :  { %1216 = shalt.err (!%p1213_p4)
}
   0xf   :  { %s1286_s19 = smov 128   ;;  %s1287_s20 = smov 8  }
  0x10   :  { %25 = dma.hbm_to_vmem [thread:$0]  %s2174_s0, 128, %s20_s16, [#allocation5], %s1286_s19, %s1286_s19, %s1287_s20  }
  0x11   :  { %s1288_s23 = smov [#allocation7]  }
  0x12   :  { %s31_s24 = sshll.u32 %s1288_s23, 4  ;;  %s32_s24 = int_to_ptr.vmem [resolvable:$true] %s31_s24 }
  0x13   :  { %s1225_s25 = scalar_lea.vmem %s32_s24, 256  ;;  %p1230_p6 = scmp.lt.s32.totalorder %s32_s24, %s32_s24 }
  0x14   :  { %p1226_p5 = scmp.ne.s32.totalorder %s32_s24, %s1225_s25  ;;  %p1231_p7 = scmp.lt.s32.totalorder %s1225_s25, %s1225_s25 }
  0x16   :  { %p1232_p8 = por %p1231_p7, %p1230_p6 }
  0x18   :  { %p1233_p9 = pnand %p1232_p8, %p1226_p5 }
  0x1a   :  { %1236 = shalt.err (!%p1233_p9)
}
  0x1b   :  { %s1289_s26 = smov 64   ;;  %s1290_s27 = smov 4  }
  0x1c   :  { %37 = dma.hbm_to_vmem [thread:$0]  %s2175_s1, 256, %s32_s24, [#allocation8], %s1289_s26, %s1289_s26, %s1290_s27  }
  0x1d   :  { %1277 = dma.done.wait [#allocation5], 2048  }
  0x1e   :  { %1278 = vsyncadd [#allocation5], 4294965248 }
  0x1f   :  { %1279 = dma.done.wait [#allocation8], 256  }
  0x20   :  { %1280 = vsyncadd [#allocation8], 4294967040  ;;  %v1195_v0 = vld [vmem:[#allocation7 + $0x8] sm:$0xff]   ;;  %v1196_v1 = vld [vmem:[#allocation7] sm:$0xff]   ;;  %vm131_vm0 = vcmask 261120   ;;  %vm51_vm1 = vcmask 7168   ;;  %v2179_v60 = vlaneseq }
  0x21   :  { %1159 = vmatprep.subr.bf16.mxu0 %v1195_v0  ;;  %1179 = vmatprep.subr.bf16.mxu1 %v1195_v0  ;;  %v1326_v2 = vld [vmem:[#allocation4] sm:$0xff]  ;;  %v1328_v3 = vld [vmem:[#allocation4 + $0x8] sm:$0xff]  ;;  %v1336_v7 = vld [vmem:[#allocation4 + $0x10] sm:$0xff]  ;;  %v1291_v26 = vmov -inf  }
  0x22   :  { %v1330_v4 = vld [vmem:[#allocation4 + $0x40] sm:$0xff]  ;;  %1160 = vmatpush3.bf16.msra.mxu0 %v1195_v0  ;;  %1181 = vmatpush3.bf16.msra.mxu1 %v1195_v0  ;;  %v104_v5 = vpack.c.bf16 %v1328_v3, %v1326_v2  ;;  %v1334_v6 = vld [vmem:[#allocation4 + $0x48] sm:$0xff]  ;;  %v1338_v8 = vld [vmem:[#allocation4 + $0x18] sm:$0xff]  ;;  %54 = vst.msk [vmem:[#allocation2 + $0x10] sm:$0xff] %vm51_vm1, %v1291_v26  ;;  %v1446_v62 = vand.u32 127, %v2179_v60 }
  0x23   :  { %1161 = vmatprep.subr.bf16.mxu0 %v1196_v1  ;;  %1180 = vmatprep.subr.bf16.mxu1 %v1196_v1  ;;  %v108_v9 = vpack.c.bf16 %v1334_v6, %v1330_v4  ;;  %v1342_v10 = vld [vmem:[#allocation4 + $0x50] sm:$0xff]  ;;  %v1344_v11 = vld [vmem:[#allocation4 + $0x58] sm:$0xff]  ;;  %v1346_v12 = vld [vmem:[#allocation4 + $0x20] sm:$0xff]  ;;  %v105_v14 = vpack.c.bf16 %v1338_v8, %v1336_v7  ;;  %52 = vst.msk [vmem:[#allocation2] sm:$0xff] %vm51_vm1, %v1291_v26 }
  0x24   :  { %1163 = vmatprep.mubr.msk.bf16.mxu0 %vm131_vm0, %v104_v5  ;;  %v1349_v13 = vld [vmem:[#allocation4 + $0x28] sm:$0xff]  ;;  %v109_v15 = vpack.c.bf16 %v1344_v11, %v1342_v10  ;;  %v1356_v16 = vld [vmem:[#allocation4 + $0x60] sm:$0xff]  ;;  %v1366_v20 = vld [vmem:[#allocation4 + $0x30] sm:$0xff]  ;;  %53 = vst.msk [vmem:[#allocation2 + $0x8] sm:$0xff] %vm51_vm1, %v1291_v26 }
  0x25   :  { %1171 = vmatprep.mubr.msk.bf16.mxu1 %vm131_vm0, %v108_v9  ;;  %v1358_v17 = vld [vmem:[#allocation4 + $0x68] sm:$0xff]  ;;  %v106_v18 = vpack.c.bf16 %v1349_v13, %v1346_v12  ;;  %v1369_v21 = vld [vmem:[#allocation4 + $0x38] sm:$0xff]  ;;  %v1372_v22 = vld [vmem:[#allocation4 + $0x70] sm:$0xff]  ;;  %55 = vst.msk [vmem:[#allocation2 + $0x18] sm:$0xff] %vm51_vm1, %v1291_v26 }
  0x26   :  { %1162 = vmatpush3.bf16.msra.mxu0 %v1196_v1  ;;  %1182 = vmatpush3.bf16.msra.mxu1 %v1196_v1  ;;  %v110_v19 = vpack.c.bf16 %v1358_v17, %v1356_v16  ;;  %v1374_v23 = vld [vmem:[#allocation4 + $0x78] sm:$0xff]  ;;  %v107_v24 = vpack.c.bf16 %v1369_v21, %v1366_v20  ;;  %56 = vst.msk [vmem:[#allocation2 + $0x20] sm:$0xff] %vm51_vm1, %v1291_v26  ;;  %57 = vst.msk [vmem:[#allocation2 + $0x28] sm:$0xff] %vm51_vm1, %v1291_v26  ;;  %v1138_v27 = vld [vmem:[%s2176_s2] ss:$0 sm:$0xff]  ;;  %s1293_s2 = smov [#allocation9]  }
  0x27   :  { %v111_v25 = vpack.c.bf16 %v1374_v23, %v1372_v22  ;;  %58 = vst.msk [vmem:[#allocation2 + $0x30] sm:$0xff] %vm51_vm1, %v1291_v26  ;;  %59 = vst.msk [vmem:[#allocation2 + $0x38] sm:$0xff] %vm51_vm1, %v1291_v26  ;;  %s1114_s30 = sshll.u32 %s1293_s2, 4  ;;  %s1115_s30 = int_to_ptr.vmem [resolvable:$true] %s1114_s30 }
  0x28   :  { %60 = vst.msk [vmem:[#allocation2 + $0x40] sm:$0xff] %vm51_vm1, %v1291_v26  ;;  %61 = vst.msk [vmem:[#allocation2 + $0x48] sm:$0xff] %vm51_vm1, %v1291_v26  ;;  %s1237_s5 = scalar_lea.vmem %s1115_s30, 16  ;;  %s1241_s6 = scalar_lea.vmem %s1115_s30, 32 }
  0x29   :  { %1164 = vmatmul.mubr.msk.bf16.vlgmr.msra.gmra.mxu0 %vm131_vm0, %v105_v14  ;;  %1172 = vmatmul.mubr.msk.bf16.vlgmr.msra.gmra.mxu1 %vm131_vm0, %v109_v15  ;;  %62 = vst.msk [vmem:[#allocation2 + $0x50] sm:$0xff] %vm51_vm1, %v1291_v26  ;;  %63 = vst.msk [vmem:[#allocation2 + $0x58] sm:$0xff] %vm51_vm1, %v1291_v26  ;;  %v1443_v61 = vld [vmem:[#allocation2 + $0x10] sm:$0xff]  ;;  %p1238_p10 = scmp.ne.s32.totalorder %s1115_s30, %s1237_s5  ;;  %p1242_p11 = scmp.lt.s32.totalorder %s1115_s30, %s1115_s30 }
  0x2a   :  { %1167 = vmatprep.mubr.msk.bf16.mxu0 %vm131_vm0, %v106_v18  ;;  %1175 = vmatprep.mubr.msk.bf16.mxu1 %vm131_vm0, %v110_v19  ;;  %64 = vst.msk [vmem:[#allocation2 + $0x60] sm:$0xff] %vm51_vm1, %v1291_v26  ;;  %65 = vst.msk [vmem:[#allocation2 + $0x68] sm:$0xff] %vm51_vm1, %v1291_v26  ;;  %v1450_v0 = vld [vmem:[#allocation2] sm:$0xff]  ;;  %p1243_p12 = scmp.lt.s32.totalorder %s1241_s6, %s1237_s5 }
  0x2b   :  { %66 = vst.msk [vmem:[#allocation2 + $0x70] sm:$0xff] %vm51_vm1, %v1291_v26  ;;  %67 = vst.msk [vmem:[#allocation2 + $0x78] sm:$0xff] %vm51_vm1, %v1291_v26 }
  0x2c   :  { %v1462_v9 = vld [vmem:[#allocation2 + $0x18] sm:$0xff]  ;;  %p1244_p13 = por %p1243_p12, %p1242_p11 }
  0x2e   :  { %p1245_p0 = pnand %p1244_p13, %p1238_p10 }
  0x31   :  { %1168 = vmatmul.mubr.msk.bf16.gmra.mxu0 %vm131_vm0, %v107_v24  ;;  %1176 = vmatmul.mubr.msk.bf16.gmra.mxu1 %vm131_vm0, %v111_v25  ;;  %v1479_v24 = vld [vmem:[#allocation2 + $0x40] sm:$0xff] }
  0x32   :  { %2202 = vst [vmem:[#allocation16_spill] sm:$0xff] %v1479_v24 }
  0xe9   :  { %v1165_v28 = vpop.f32.mrf.mxu0  ;;  %v1173_v29 = vpop.f32.mrf.mxu1 }
  0xea   :  { %v199_v30 = vadd.f32 %v1165_v28, %v1138_v27  ;;  %v1427_v54 = vadd.f32 %v1173_v29, %v1138_v27 }
  0xeb   :  { %v190_v31 = vpop.f32.mrf.mxu0  ;;  %v222_v32 = vpop.f32.mrf.mxu1 }
  0xec   :  { %v191_v33 = vadd.f32 %v1138_v27, %v190_v31  ;;  %257 = vmax.xlane.f32.xlu1 %v199_v30  ;;  %v1403_v39 = vadd.f32 %v1138_v27, %v222_v32 }
  0xed   :  { %v1166_v34 = vpop.f32.mrf.mxu0  ;;  %v1174_v35 = vpop.f32.mrf.mxu1 }
  0xee   :  { %v1401_v36 = vadd.f32 %v1166_v34, %v1138_v27  ;;  %253 = vmax.xlane.f32.xlu0 %v191_v33  ;;  %v1412_v47 = vadd.f32 %v1174_v35, %v1138_v27  ;;  %v1518_v35 = vld [vmem:[#allocation2 + $0x8] sm:$0xff] }
  0xef   :  { %v193_v37 = vpop.f32.mrf.mxu0  ;;  %v225_v38 = vpop.f32.mrf.mxu1 }
  0xf0   :  { %259 = vmax.xlane.f32.xlu1 %v1401_v36  ;;  %v1406_v42 = vadd.f32 %v1138_v27, %v225_v38  ;;  %v1409_v44 = vadd.f32 %v1138_v27, %v193_v37 }
  0xf1   :  { %v1169_v40 = vpop.f32.mrf.mxu0  ;;  %v1177_v41 = vpop.f32.mrf.mxu1 }
  0xf2   :  { %269 = vmax.xlane.f32.xlu0 %v1403_v39  ;;  %v1414_v48 = vadd.f32 %v1169_v40, %v1138_v27  ;;  %v1438_v59 = vadd.f32 %v1177_v41, %v1138_v27 }
  0xf3   :  { %v206_v43 = vpop.f32.mrf.mxu0  ;;  %v238_v46 = vpop.f32.mrf.mxu1 }
  0xf4   :  { %271 = vmax.xlane.f32.xlu1 %v1406_v42  ;;  %v1420_v51 = vadd.f32 %v1138_v27, %v206_v43  ;;  %v1432_v57 = vadd.f32 %v1138_v27, %v238_v46  ;;  %v1540_v43 = vld [vmem:[#allocation2 + $0x58] sm:$0xff] }
  0xf5   :  { %v1170_v45 = vpop.f32.mrf.mxu0  ;;  %v1178_v50 = vpop.f32.mrf.mxu1 }
  0xf6   :  { %255 = vmax.xlane.f32.xlu0 %v1409_v44  ;;  %v1418_v49 = vadd.f32 %v1170_v45, %v1138_v27  ;;  %v1424_v52 = vadd.f32 %v1178_v50, %v1138_v27 }
  0xf7   :  { %v209_v53 = vpop.f32.mrf.mxu0  ;;  %v241_v56 = vpop.f32.mrf.mxu1 }
  0xf8   :  { %275 = vmax.xlane.f32.xlu1 %v1412_v47  ;;  %v1430_v55 = vadd.f32 %v1138_v27, %v209_v53  ;;  %v1436_v58 = vadd.f32 %v1138_v27, %v241_v56  ;;  %v1560_v53 = vld [vmem:[#allocation2 + $0x30] sm:$0xff] }
  0xf9   :  { %2205 = vst [vmem:[#allocation19_spill] sm:$0xff] %v1560_v53 }
  0xfa   :  { %265 = vmax.xlane.f32.xlu0 %v1414_v48 }
  0xfc   :  { %267 = vmax.xlane.f32.xlu1 %v1418_v49 }
  0xfe   :  { %261 = vmax.xlane.f32.xlu0 %v1420_v51 }
 0x100   :  { %283 = vmax.xlane.f32.xlu1 %v1424_v52 }
 0x102   :  { %273 = vmax.xlane.f32.xlu0 %v1427_v54 }
 0x104   :  { %263 = vmax.xlane.f32.xlu1 %v1430_v55 }
 0x106   :  { %277 = vmax.xlane.f32.xlu0 %v1432_v57 }
 0x108   :  { %279 = vmax.xlane.f32.xlu1 %v1436_v58 }
 0x10a   :  { %281 = vmax.xlane.f32.xlu0 %v1438_v59 }
 0x175   :  { %v1448_v63 = vpop.xlane.xlu1 %257 }
 0x176   :  { %vm579_vm2 = vcmp.gt.f32.partialorder %v1448_v63, %v1443_v61  ;;  %vm289_vm3 = vcmp.ge.f32.partialorder %v199_v30, %v1448_v63  ;;  %v1499_v30 = vld [vmem:[#allocation2 + $0x48] sm:$0xff] }
 0x177   :  { %v660_v1 = vsel %vm579_vm2, %v1448_v63, %v1443_v61  ;;  %v1460_v5 = vpop.xlane.xlu0 %253  ;;  %v1465_v14 = vsel %vm289_vm3, %v1446_v62, 128  ;;  %2204 = vst [vmem:[#allocation18_spill] sm:$0xff] %v1499_v30 }
 0x178   :  { %676 = vst.msk [vmem:[#allocation2 + $0x10] sm:$0xff] %vm51_vm1, %v660_v1  ;;  %vm287_vm4 = vcmp.ge.f32.partialorder %v191_v33, %v1460_v5  ;;  %vm577_vm5 = vcmp.gt.f32.partialorder %v1460_v5, %v1450_v0  ;;  %v348_v15 = vshra.s32 %v1465_v14, 16 }
 0x179   :  { %v658_v18 = vsel %vm577_vm5, %v1460_v5, %v1450_v0  ;;  %v1477_v19 = vpop.xlane.xlu1 %259  ;;  %v1482_v25 = vsel %vm287_vm4, %v1446_v62, 128 }
 0x17a   :  { %674 = vst.msk [vmem:[#allocation2] sm:$0xff] %vm51_vm1, %v658_v18  ;;  %vm580_vm6 = vcmp.gt.f32.partialorder %v1477_v19, %v1462_v9  ;;  %v1487_v26 = vcvt.s32.f32 %v348_v15  ;;  %vm290_vm7 = vcmp.ge.f32.partialorder %v1401_v36, %v1477_v19  ;;  %v320_v27 = vshra.s32 %v1482_v25, 16 }
 0x17b   :  { %v661_v28 = vsel %vm580_vm6, %v1477_v19, %v1462_v9  ;;  %v1497_v29 = vpop.xlane.xlu0 %269  ;;  %v1502_v31 = vsel %vm290_vm7, %v1446_v62, 128 }
 0x17c   :  { %2203 = vst [vmem:[#allocation17_spill] sm:$0xff] %v1497_v29  ;;  %677 = vst.msk [vmem:[#allocation2 + $0x18] sm:$0xff] %vm51_vm1, %v661_v28  ;;  %vm295_vm8 = vcmp.ge.f32.partialorder %v1403_v39, %v1497_v29  ;;  %vm585_vm9 = vcmp.gt.f32.partialorder %v1497_v29, %v1479_v24  ;;  %351 = vmin.xlane.f32.xlu0 %v1487_v26  ;;  %v362_v32 = vshra.s32 %v1502_v31, 16  ;;  %v1520_v36 = vcvt.s32.f32 %v320_v27  ;;  %v1582_v28 = vld [vmem:[#allocation2 + $0x38] sm:$0xff] }
 0x17d   :  { %v666_v33 = vsel %vm585_vm9, %v1497_v29, %v1479_v24  ;;  %v1516_v34 = vpop.xlane.xlu1 %271  ;;  %v1523_v37 = vsel %vm295_vm8, %v1446_v62, 128  ;;  %2207 = vst [vmem:[#allocation21_spill] sm:$0xff] %v1582_v28 }
 0x17e   :  { %682 = vst.msk [vmem:[#allocation2 + $0x40] sm:$0xff] %vm51_vm1, %v666_v33  ;;  %vm296_vm10 = vcmp.ge.f32.partialorder %v1406_v42, %v1516_v34  ;;  %vm586_vm11 = vcmp.gt.f32.partialorder %v1516_v34, %v1499_v30  ;;  %v1530_v38 = vcvt.s32.f32 %v362_v32  ;;  %v432_v39 = vshra.s32 %v1523_v37, 16 }
 0x17f   :  { %v667_v40 = vsel %vm586_vm11, %v1516_v34, %v1499_v30  ;;  %v1538_v41 = vpop.xlane.xlu0 %255  ;;  %v1543_v45 = vsel %vm296_vm10, %v1446_v62, 128 }
 0x180   :  { %683 = vst.msk [vmem:[#allocation2 + $0x48] sm:$0xff] %vm51_vm1, %v667_v40  ;;  %vm288_vm12 = vcmp.ge.f32.partialorder %v1409_v44, %v1538_v41  ;;  %vm578_vm13 = vcmp.gt.f32.partialorder %v1538_v41, %v1518_v35  ;;  %365 = vmin.xlane.f32.xlu1 %v1530_v38  ;;  %323 = vmin.xlane.f32.xlu0 %v1520_v36  ;;  %v446_v42 = vshra.s32 %v1543_v45, 16  ;;  %v1562_v44 = vcvt.s32.f32 %v432_v39  ;;  %v1602_v40 = vld [vmem:[#allocation2 + $0x20] sm:$0xff] }
 0x181   :  { %v659_v46 = vsel %vm578_vm13, %v1538_v41, %v1518_v35  ;;  %v1558_v50 = vpop.xlane.xlu1 %275  ;;  %v1565_v56 = vsel %vm288_vm12, %v1446_v62, 128  ;;  %2208 = vst [vmem:[#allocation22_spill] sm:$0xff] %v1602_v40 }
 0x182   :  { %675 = vst.msk [vmem:[#allocation2 + $0x8] sm:$0xff] %vm51_vm1, %v659_v46  ;;  %vm298_vm14 = vcmp.ge.f32.partialorder %v1412_v47, %v1558_v50  ;;  %vm588_vm15 = vcmp.gt.f32.partialorder %v1558_v50, %v1540_v43  ;;  %v1572_v1 = vcvt.s32.f32 %v446_v42  ;;  %v334_v15 = vshra.s32 %v1565_v56, 16 }
 0x183   :  { %v669_v18 = vsel %vm588_vm15, %v1558_v50, %v1540_v43  ;;  %v1580_v27 = vpop.xlane.xlu0 %265  ;;  %v1585_v32 = vsel %vm298_vm14, %v1446_v62, 128 }
 0x184   :  { %2206 = vst [vmem:[#allocation20_spill] sm:$0xff] %v1580_v27  ;;  %685 = vst.msk [vmem:[#allocation2 + $0x58] sm:$0xff] %vm51_vm1, %v669_v18  ;;  %vm293_vm3 = vcmp.ge.f32.partialorder %v1414_v48, %v1580_v27  ;;  %vm583_vm4 = vcmp.gt.f32.partialorder %v1580_v27, %v1560_v53  ;;  %449 = vmin.xlane.f32.xlu1 %v1572_v1  ;;  %435 = vmin.xlane.f32.xlu0 %v1562_v44  ;;  %v474_v47 = vshra.s32 %v1585_v32, 16 }
 0x185   :  { %v664_v33 = vsel %vm583_vm4, %v1580_v27, %v1560_v53  ;;  %v1600_v39 = vpop.xlane.xlu1 %267  ;;  %v694_v48 = vmul.f32 %v1328_v3, %v1328_v3  ;;  %v1607_v42 = vsel %vm293_vm3, %v1446_v62, 128  ;;  %v1614_v18 = vcvt.s32.f32 %v334_v15  ;;  %v1624_v27 = vld [vmem:[#allocation2 + $0x78] sm:$0xff] }
 0x186   :  { %680 = vst.msk [vmem:[#allocation2 + $0x30] sm:$0xff] %vm51_vm1, %v664_v33  ;;  %vm2196_vm7 = vcmp.gt.f32.partialorder %v1600_v39, %v1582_v28  ;;  %v1612_v46 = vcvt.s32.f32 %v474_v47  ;;  %v404_v60 = vshra.s32 %v1607_v42, 16  ;;  %2210 = vst [vmem:[#allocation24_spill] sm:$0xff] %v1624_v27  ;;  %v1640_v33 = vld [vmem:[#allocation2 + $0x50] sm:$0xff] }
 0x187   :  { %v665_v3 = vsel %vm2196_vm7, %v1600_v39, %v1582_v28  ;;  %v1622_v53 = vpop.xlane.xlu0 %261  ;;  %2211 = vst [vmem:[#allocation25_spill] sm:$0xff] %v1640_v33 }
 0x188   :  { %2209 = vst [vmem:[#allocation23_spill] sm:$0xff] %v1622_v53  ;;  %681 = vst.msk [vmem:[#allocation2 + $0x38] sm:$0xff] %vm51_vm1, %v665_v3  ;;  %vm291_vm8 = vcmp.ge.f32.partialorder %v1420_v51, %v1622_v53  ;;  %vm581_vm10 = vcmp.gt.f32.partialorder %v1622_v53, %v1602_v40  ;;  %477 = vmin.xlane.f32.xlu1 %v1612_v46  ;;  %337 = vmin.xlane.f32.xlu0 %v1614_v18  ;;  %v712_v3 = vsel %vm131_vm0, %v694_v48, 0.0 }
 0x189   :  { %v662_v15 = vsel %vm581_vm10, %v1622_v53, %v1602_v40  ;;  %v1638_v47 = vpop.xlane.xlu1 %283  ;;  %v696_v51 = vmul.f32 %v1338_v8, %v1338_v8  ;;  %v1646_v28 = vsel %vm291_vm8, %v1446_v62, 128  ;;  %v1651_v24 = vcvt.s32.f32 %v404_v60  ;;  %v1661_v8 = vld [vmem:[#allocation2 + $0x28] sm:$0xff] }
 0x18a   :  { %678 = vst.msk [vmem:[#allocation2 + $0x20] sm:$0xff] %vm51_vm1, %v662_v15  ;;  %vm2190_vm12 = vcmp.gt.f32.partialorder %v1638_v47, %v1624_v27  ;;  %v376_v40 = vshra.s32 %v1646_v28, 16  ;;  %2213 = vst [vmem:[#allocation27_spill] sm:$0xff] %v1661_v8 }
 0x18b   :  { %v673_v48 = vsel %vm2190_vm12, %v1638_v47, %v1624_v27  ;;  %v1659_v53 = vpop.xlane.xlu0 %273  ;;  %v1676_v27 = vld [vmem:[#allocation2 + $0x60] sm:$0xff] }
 0x18c   :  { %2212 = vst [vmem:[#allocation26_spill] sm:$0xff] %v1659_v53  ;;  %689 = vst.msk [vmem:[#allocation2 + $0x78] sm:$0xff] %vm51_vm1, %v673_v48  ;;  %vm297_vm14 = vcmp.ge.f32.partialorder %v1427_v54, %v1659_v53  ;;  %vm587_vm3 = vcmp.gt.f32.partialorder %v1659_v53, %v1640_v33  ;;  %713 = vadd.xlane.f32.xlu1 %v712_v3  ;;  %407 = vmin.xlane.f32.xlu0 %v1651_v24  ;;  %v718_v48 = vsel %vm131_vm0, %v696_v51, 0.0 }
 0x18d   :  { %v668_v60 = vsel %vm587_vm3, %v1659_v53, %v1640_v33  ;;  %v1674_v15 = vpop.xlane.xlu1 %263  ;;  %2215 = vst [vmem:[#allocation29_spill] sm:$0xff] %v1676_v27  ;;  %v698_v54 = vmul.f32 %v1349_v13, %v1349_v13  ;;  %v1682_v29 = vsel %vm297_vm14, %v1446_v62, 128  ;;  %v1687_v3 = vcvt.s32.f32 %v376_v40  ;;  %v1697_v13 = vld [vmem:[#allocation2 + $0x68] sm:$0xff] }
 0x18e   :  { %2214 = vst [vmem:[#allocation28_spill] sm:$0xff] %v1674_v15  ;;  %684 = vst.msk [vmem:[#allocation2 + $0x50] sm:$0xff] %vm51_vm1, %v668_v60  ;;  %vm2193_vm8 = vcmp.gt.f32.partialorder %v1674_v15, %v1661_v8  ;;  %v460_v33 = vshra.s32 %v1682_v29, 16 }
 0x18f   :  { %v663_v51 = vsel %vm2193_vm8, %v1674_v15, %v1661_v8  ;;  %v1695_v53 = vpop.xlane.xlu0 %277  ;;  %2217 = vst [vmem:[#allocation31_spill] sm:$0xff] %v1697_v13  ;;  %v1712_v8 = vld [vmem:[#allocation2 + $0x70] sm:$0xff] }
 0x190   :  { %2216 = vst [vmem:[#allocation30_spill] sm:$0xff] %v1695_v53  ;;  %679 = vst.msk [vmem:[#allocation2 + $0x28] sm:$0xff] %vm51_vm1, %v663_v51  ;;  %vm299_vm14 = vcmp.ge.f32.partialorder %v1432_v57, %v1695_v53  ;;  %vm2197_vm12 = vcmp.gt.f32.partialorder %v1695_v53, %v1676_v27  ;;  %719 = vadd.xlane.f32.xlu1 %v718_v48  ;;  %379 = vmin.xlane.f32.xlu0 %v1687_v3  ;;  %v724_v51 = vsel %vm131_vm0, %v698_v54, 0.0 }
 0x191   :  { %v670_v40 = vsel %vm2197_vm12, %v1695_v53, %v1676_v27  ;;  %v1710_v60 = vpop.xlane.xlu1 %279  ;;  %v700_v57 = vmul.f32 %v1369_v21, %v1369_v21  ;;  %v1718_v30 = vsel %vm299_vm14, %v1446_v62, 128  ;;  %v1723_v48 = vcvt.s32.f32 %v460_v33 }
 0x192   :  { %2218 = vst [vmem:[#allocation32_spill] sm:$0xff] %v1710_v60  ;;  %686 = vst.msk [vmem:[#allocation2 + $0x60] sm:$0xff] %vm51_vm1, %v670_v40  ;;  %vm2198_vm8 = vcmp.gt.f32.partialorder %v1710_v60, %v1697_v13  ;;  %v488_v27 = vshra.s32 %v1718_v30, 16  ;;  %vm294_vm14 = vcmp.ge.f32.partialorder %v1418_v49, %v1600_v39  ;;  %v702_v49 = vmul.f32 %v1334_v6, %v1334_v6 }
 0x193   :  { %v671_v54 = vsel %vm2198_vm8, %v1710_v60, %v1697_v13  ;;  %v1731_v53 = vpop.xlane.xlu0 %281  ;;  %v730_v33 = vsel %vm131_vm0, %v700_v57, 0.0  ;;  %vm302_vm8 = vcmp.ge.f32.partialorder %v1424_v52, %v1638_v47  ;;  %v693_v57 = vmul.f32 %v1326_v2, %v1326_v2 }
 0x194   :  { %687 = vst.msk [vmem:[#allocation2 + $0x68] sm:$0xff] %vm51_vm1, %v671_v54  ;;  %vm301_vm7 = vcmp.ge.f32.partialorder %v1438_v59, %v1731_v53  ;;  %vm591_vm12 = vcmp.gt.f32.partialorder %v1731_v53, %v1712_v8  ;;  %725 = vadd.xlane.f32.xlu1 %v724_v51  ;;  %463 = vmin.xlane.f32.xlu0 %v1723_v48  ;;  %v1753_v59 = vcvt.s32.f32 %v488_v27  ;;  %v1757_v54 = vsel %vm294_vm14, %v1446_v62, 128 }
 0x195   :  { %v672_v21 = vsel %vm591_vm12, %v1731_v53, %v1712_v8  ;;  %v1750_v40 = vsel %vm301_vm7, %v1446_v62, 128  ;;  %v736_v6 = vsel %vm131_vm0, %v702_v49, 0.0  ;;  %v418_v27 = vshra.s32 %v1757_v54, 16  ;;  %v767_v8 = vld [vmem:[#allocation2 + $0x50] sm:$0xff] }
 0x196   :  { %688 = vst.msk [vmem:[#allocation2 + $0x70] sm:$0xff] %vm51_vm1, %v672_v21  ;;  %v516_v51 = vshra.s32 %v1750_v40, 16  ;;  %v1769_v21 = vsel %vm302_vm8, %v1446_v62, 128  ;;  %vm292_vm7 = vcmp.ge.f32.partialorder %v1430_v55, %v1674_v15  ;;  %v709_v52 = vsel %vm131_vm0, %v693_v57, 0.0 }
 0x197   :  { %v1777_v49 = vcvt.s32.f32 %v418_v27  ;;  %v530_v2 = vshra.s32 %v1769_v21, 16  ;;  %vm300_vm8 = vcmp.ge.f32.partialorder %v1436_v58, %v1710_v60 }
 0x198   :  { %731 = vadd.xlane.f32.xlu1 %v730_v33  ;;  %491 = vmin.xlane.f32.xlu0 %v1753_v59  ;;  %v1765_v13 = vcvt.s32.f32 %v516_v51  ;;  %v695_v33 = vmul.f32 %v1336_v7, %v1336_v7  ;;  %v1781_v51 = vsel %vm292_vm7, %v1446_v62, 128  ;;  %v1793_v27 = vsel %vm300_vm8, %v1446_v62, 128 }
 0x199   :  { %v1789_v57 = vcvt.s32.f32 %v530_v2  ;;  %v390_v7 = vshra.s32 %v1781_v51, 16  ;;  %v701_v2 = vmul.f32 %v1330_v4, %v1330_v4  ;;  %v347_v4 = vand.u32 65535, %v1465_v14 }
 0x19a   :  { %v715_v55 = vsel %vm131_vm0, %v695_v33, 0.0  ;;  %v502_v33 = vshra.s32 %v1793_v27, 16  ;;  %v501_v0 = vand.u32 65535, %v1793_v27 }
 0x19b   :  { %v1799_v60 = vcvt.s32.f32 %v390_v7  ;;  %v349_v7 = vcvt.s32.f32 %v347_v4  ;;  %v473_v4 = vand.u32 65535, %v1585_v32 }
 0x19c   :  { %737 = vadd.xlane.f32.xlu1 %v736_v6  ;;  %519 = vmin.xlane.f32.xlu0 %v1765_v13  ;;  %v697_v6 = vmul.f32 %v1346_v12, %v1346_v12  ;;  %v1806_v15 = vcvt.s32.f32 %v502_v33  ;;  %v503_v19 = vcvt.s32.f32 %v501_v0 }
 0x19e   :  { %v721_v58 = vsel %vm131_vm0, %v697_v6, 0.0 }
 0x1a0   :  { %421 = vmin.xlane.f32.xlu1 %v1777_v49  ;;  %710 = vadd.xlane.f32.xlu0 %v709_v52  ;;  %v699_v52 = vmul.f32 %v1366_v20, %v1366_v20  ;;  %v1292_v20 = vmov 0  }
 0x1a1   :  { %1194 = vset.pattern.permute.xlu1 %v1292_v20  ;;  %68 = vst.msk [vmem:[#allocation3] sm:$0xff] %vm51_vm1, %v1292_v20  ;;  %69 = vst.msk [vmem:[#allocation3 + $0x8] sm:$0xff] %vm51_vm1, %v1292_v20  ;;  %1193 = vset.pattern.permute.xlu0 %v1292_v20 }
 0x1a2   :  { %v727_v12 = vsel %vm131_vm0, %v699_v52, 0.0  ;;  %70 = vst.msk [vmem:[#allocation3 + $0x10] sm:$0xff] %vm51_vm1, %v1292_v20  ;;  %71 = vst.msk [vmem:[#allocation3 + $0x18] sm:$0xff] %vm51_vm1, %v1292_v20 }
 0x1a3   :  { %72 = vst.msk [vmem:[#allocation3 + $0x20] sm:$0xff] %vm51_vm1, %v1292_v20  ;;  %73 = vst.msk [vmem:[#allocation3 + $0x28] sm:$0xff] %vm51_vm1, %v1292_v20 }
 0x1a4   :  { %533 = vmin.xlane.f32.xlu1 %v1789_v57  ;;  %716 = vadd.xlane.f32.xlu0 %v715_v55  ;;  %v733_v55 = vsel %vm131_vm0, %v701_v2, 0.0  ;;  %74 = vst.msk [vmem:[#allocation3 + $0x30] sm:$0xff] %vm51_vm1, %v1292_v20  ;;  %75 = vst.msk [vmem:[#allocation3 + $0x38] sm:$0xff] %vm51_vm1, %v1292_v20 }
 0x1a5   :  { %76 = vst.msk [vmem:[#allocation3 + $0x40] sm:$0xff] %vm51_vm1, %v1292_v20  ;;  %77 = vst.msk [vmem:[#allocation3 + $0x48] sm:$0xff] %vm51_vm1, %v1292_v20 }
 0x1a6   :  { %78 = vst.msk [vmem:[#allocation3 + $0x50] sm:$0xff] %vm51_vm1, %v1292_v20  ;;  %79 = vst.msk [vmem:[#allocation3 + $0x58] sm:$0xff] %vm51_vm1, %v1292_v20 }
 0x1a7   :  { %80 = vst.msk [vmem:[#allocation3 + $0x60] sm:$0xff] %vm51_vm1, %v1292_v20  ;;  %81 = vst.msk [vmem:[#allocation3 + $0x68] sm:$0xff] %vm51_vm1, %v1292_v20 }
 0x1a8   :  { %393 = vmin.xlane.f32.xlu1 %v1799_v60  ;;  %722 = vadd.xlane.f32.xlu0 %v721_v58  ;;  %82 = vst.msk [vmem:[#allocation3 + $0x70] sm:$0xff] %vm51_vm1, %v1292_v20  ;;  %83 = vst.msk [vmem:[#allocation3 + $0x78] sm:$0xff] %vm51_vm1, %v1292_v20  ;;  %v319_v58 = vand.u32 65535, %v1482_v25  ;;  %v594_v9 = vld [vmem:[#allocation3 + $0x8] sm:$0xff] }
 0x1aa   :  { %v321_v2 = vcvt.s32.f32 %v319_v58 }
 0x1ac   :  { %505 = vmin.xlane.f32.xlu1 %v1806_v15  ;;  %728 = vadd.xlane.f32.xlu0 %v727_v12  ;;  %v602_v50 = vld [vmem:[#allocation3 + $0x48] sm:$0xff]  ;;  %v601_v34 = vld [vmem:[#allocation3 + $0x40] sm:$0xff] }
 0x1ad   :  { %v603_v35 = vld [vmem:[#allocation3 + $0x50] sm:$0xff] }
 0x1b0   :  { %734 = vadd.xlane.f32.xlu0 %v733_v55  ;;  %v361_v55 = vand.u32 65535, %v1502_v31 }
 0x1b2   :  { %v363_v20 = vcvt.s32.f32 %v361_v55  ;;  %v445_v55 = vand.u32 65535, %v1543_v45 }
 0x205   :  { %v1827_v6 = vpop.xlane.xlu0 %351 }
 0x206   :  { %vm353_vm14 = vcmp.eq.f32.partialorder %v1487_v26, %v1827_v6 }
 0x207   :  { %v354_v52 = vsel %vm353_vm14, %v349_v7, inf }
 0x208   :  { %355 = vmin.xlane.f32.xlu0 %v354_v52  ;;  %v475_v52 = vcvt.s32.f32 %v473_v4  ;;  %v459_v4 = vand.u32 65535, %v1682_v29 }
 0x209   :  { %v1832_v33 = vpop.xlane.xlu1 %365  ;;  %v1834_v12 = vpop.xlane.xlu0 %323 }
 0x20a   :  { %vm325_vm7 = vcmp.eq.f32.partialorder %v1520_v36, %v1834_v12  ;;  %vm367_vm8 = vcmp.eq.f32.partialorder %v1530_v38, %v1832_v33  ;;  %v333_v36 = vand.u32 65535, %v1565_v56  ;;  %v447_v56 = vcvt.s32.f32 %v445_v55 }
 0x20b   :  { %v326_v14 = vsel %vm325_vm7, %v321_v2, inf  ;;  %v368_v7 = vsel %vm367_vm8, %v363_v20, inf  ;;  %v461_v45 = vcvt.s32.f32 %v459_v4  ;;  %v708_v55 = vmul.f32 %v1374_v23, %v1374_v23 }
 0x20c   :  { %327 = vmin.xlane.f32.xlu1 %v326_v14  ;;  %v335_v32 = vcvt.s32.f32 %v333_v36  ;;  %v706_v36 = vmul.f32 %v1358_v17, %v1358_v17  ;;  %v403_v17 = vand.u32 65535, %v1607_v42  ;;  %v375_v42 = vand.u32 65535, %v1646_v28 }
 0x20d   :  { %v1841_v25 = vpop.xlane.xlu1 %449  ;;  %v1843_v26 = vpop.xlane.xlu0 %435 }
 0x20e   :  { %vm451_vm8 = vcmp.eq.f32.partialorder %v1572_v1, %v1841_v25  ;;  %v431_v1 = vand.u32 65535, %v1523_v37  ;;  %v748_v29 = vsel %vm131_vm0, %v706_v36, 0.0 }
 0x210   :  { %369 = vmin.xlane.f32.xlu1 %v368_v7  ;;  %v452_v7 = vsel %vm451_vm8, %v447_v56, inf  ;;  %v515_v56 = vand.u32 65535, %v1750_v40 }
 0x211   :  { %v1846_v58 = vpop.xlane.xlu1 %477  ;;  %v1848_v31 = vpop.xlane.xlu0 %337 }
 0x212   :  { %vm479_vm14 = vcmp.eq.f32.partialorder %v1612_v46, %v1846_v58  ;;  %vm339_vm7 = vcmp.eq.f32.partialorder %v1614_v18, %v1848_v31  ;;  %v704_v46 = vmul.f32 %v1344_v11, %v1344_v11  ;;  %v517_v23 = vcvt.s32.f32 %v515_v56  ;;  %v761_v56 = vld [vmem:[#allocation2 + $0x20] sm:$0xff] }
 0x213   :  { %v480_v38 = vsel %vm479_vm14, %v475_v52, inf  ;;  %v340_v14 = vsel %vm339_vm7, %v335_v32, inf  ;;  %vm437_vm7 = vcmp.eq.f32.partialorder %v1562_v44, %v1843_v26  ;;  %v433_v32 = vcvt.s32.f32 %v431_v1  ;;  %v758_v1 = vld [vmem:[#allocation2 + $0x8] sm:$0xff] }
 0x214   :  { %481 = vmin.xlane.f32.xlu1 %v480_v38  ;;  %v742_v52 = vsel %vm131_vm0, %v704_v46, 0.0  ;;  %v754_v44 = vsel %vm131_vm0, %v708_v55, 0.0  ;;  %v759_v55 = vld [vmem:[#allocation2 + $0x10] sm:$0xff] }
 0x215   :  { %v1855_v2 = vpop.xlane.xlu0 %407  ;;  %v438_v37 = vsel %vm437_vm7, %v433_v32, inf }
 0x216   :  { %vm409_vm8 = vcmp.eq.f32.partialorder %v1651_v24, %v1855_v2  ;;  %v377_v24 = vcvt.s32.f32 %v375_v42 }
 0x218   :  { %341 = vmin.xlane.f32.xlu1 %v340_v14  ;;  %v405_v14 = vcvt.s32.f32 %v403_v17 }
 0x219   :  { %v1860_v20 = vpop.xlane.xlu0 %379 }
 0x21a   :  { %v410_v46 = vsel %vm409_vm8, %v405_v14, inf  ;;  %vm381_vm7 = vcmp.eq.f32.partialorder %v1687_v3, %v1860_v20  ;;  %v705_v3 = vmul.f32 %v1356_v16, %v1356_v16 }
 0x21c   :  { %453 = vmin.xlane.f32.xlu1 %v452_v7  ;;  %v703_v7 = vmul.f32 %v1342_v10, %v1342_v10  ;;  %v745_v32 = vsel %vm131_vm0, %v705_v3, 0.0  ;;  %v529_v3 = vand.u32 65535, %v1769_v21 }
 0x21d   :  { %v1865_v18 = vpop.xlane.xlu0 %463 }
 0x21e   :  { %vm465_vm14 = vcmp.eq.f32.partialorder %v1723_v48, %v1865_v18  ;;  %v739_v40 = vsel %vm131_vm0, %v703_v7, 0.0  ;;  %v766_v7 = vld [vmem:[#allocation2 + $0x48] sm:$0xff] }
 0x21f   :  { %v466_v38 = vsel %vm465_vm14, %v461_v45, inf  ;;  %v487_v45 = vand.u32 65535, %v1718_v30  ;;  %v707_v30 = vmul.f32 %v1372_v22, %v1372_v22 }
 0x220   :  { %743 = vadd.xlane.f32.xlu1 %v742_v52  ;;  %467 = vmin.xlane.f32.xlu0 %v466_v38  ;;  %v382_v52 = vsel %vm381_vm7, %v377_v24, inf }
 0x221   :  { %v1875_v11 = vpop.xlane.xlu0 %491  ;;  %v489_v28 = vcvt.s32.f32 %v487_v45  ;;  %v417_v45 = vand.u32 65535, %v1757_v54 }
 0x222   :  { %vm493_vm8 = vcmp.eq.f32.partialorder %v1753_v59, %v1875_v11  ;;  %v751_v59 = vsel %vm131_vm0, %v707_v30, 0.0 }
 0x224   :  { %749 = vadd.xlane.f32.xlu1 %v748_v29  ;;  %439 = vmin.xlane.f32.xlu0 %v438_v37  ;;  %v494_v29 = vsel %vm493_vm8, %v489_v28, inf  ;;  %v419_v28 = vcvt.s32.f32 %v417_v45  ;;  %vm904_vm8 = vcmask 523712  }
 0x225   :  { %v1883_v48 = vpop.xlane.xlu0 %519 }
 0x226   :  { %vm521_vm14 = vcmp.eq.f32.partialorder %v1765_v13, %v1883_v48  ;;  %v714_v13 = vpop.xlane.xlu1 %713 }
 0x227   :  { %v522_v4 = vsel %vm521_vm14, %v517_v23, inf  ;;  %v774_v38 = vadd.f32 %v758_v1, %v714_v13 }
 0x228   :  { %755 = vadd.xlane.f32.xlu1 %v754_v44  ;;  %411 = vmin.xlane.f32.xlu0 %v410_v46  ;;  %v760_v44 = vld [vmem:[#allocation2 + $0x18] sm:$0xff] }
 0x229   :  { %v711_v36 = vpop.xlane.xlu0 %710 }
 0x22a   :  { %v720_v37 = vpop.xlane.xlu1 %719 }
 0x22b   :  { %v776_v16 = vadd.f32 %v760_v44, %v720_v37 }
 0x22c   :  { %523 = vmin.xlane.f32.xlu0 %v522_v4  ;;  %v757_v4 = vld [vmem:[#allocation2] sm:$0xff] }
 0x22d   :  { %v717_v10 = vpop.xlane.xlu0 %716  ;;  %v773_v22 = vadd.f32 %v757_v4, %v711_v36 }
 0x22e   :  { %v775_v17 = vadd.f32 %v759_v55, %v717_v10  ;;  %v726_v23 = vpop.xlane.xlu1 %725 }
 0x230   :  { %383 = vmin.xlane.f32.xlu0 %v382_v52 }
 0x231   :  { %v723_v14 = vpop.xlane.xlu0 %722 }
 0x232   :  { %v777_v46 = vadd.f32 %v761_v56, %v723_v14  ;;  %v1904_v42 = vpop.xlane.xlu1 %731  ;;  %v372_v56 = vcvt.f32.s32 %v1832_v33  ;;  %v596_v33 = vld [vmem:[#allocation3 + $0x18] sm:$0xff] }
 0x234   :  { %740 = vadd.xlane.f32.xlu0 %v739_v40 }
 0x235   :  { %v1921_v30 = vpop.xlane.xlu0 %728 }
 0x236   :  { %v738_v24 = vpop.xlane.xlu1 %737 }
 0x237   :  { %v782_v52 = vadd.f32 %v766_v7, %v738_v24  ;;  %v373_v7 = vshll.u32 %v372_v56, 16 }
 0x238   :  { %495 = vmin.xlane.f32.xlu0 %v494_v29  ;;  %v389_v29 = vand.u32 65535, %v1781_v51 }
 0x239   :  { %809 = vperm.xlu1 %1194, %v774_v38   ;;  %v531_v38 = vcvt.s32.f32 %v529_v3  ;;  %v1923_v55 = vpop.xlane.xlu0 %734  ;;  %v344_v3 = vcvt.f32.s32 %v1848_v31 }
 0x23a   :  { %v1906_v40 = vpop.xlane.xlu1 %421  ;;  %v391_v54 = vcvt.s32.f32 %v389_v29  ;;  %v456_v29 = vcvt.f32.s32 %v1841_v25  ;;  %v470_v25 = vcvt.f32.s32 %v1865_v18 }
 0x23b   :  { %vm423_vm0 = vcmp.eq.f32.partialorder %v1777_v49, %v1906_v40 }
 0x23c   :  { %746 = vadd.xlane.f32.xlu0 %v745_v32  ;;  %v424_v1 = vsel %vm423_vm0, %v419_v28, inf  ;;  %v762_v32 = vld [vmem:[#allocation2 + $0x28] sm:$0xff]  ;;  %vm911_vm0 = vcmask 589312  }
 0x23d   :  { %812 = vperm.xlu1 %1194, %v775_v17   ;;  %v778_v21 = vadd.f32 %v762_v32, %v726_v23 }
 0x23e   :  { %v1909_v13 = vpop.xlane.xlu1 %533 }
 0x23f   :  { %vm535_vm14 = vcmp.eq.f32.partialorder %v1789_v57, %v1909_v13  ;;  %v358_v57 = vcvt.f32.s32 %v1827_v6  ;;  %v593_v6 = vld [vmem:[#allocation3] sm:$0xff] }
 0x240   :  { %752 = vadd.xlane.f32.xlu0 %v751_v59  ;;  %v536_v10 = vsel %vm535_vm14, %v531_v38, inf  ;;  %v330_v59 = vcvt.f32.s32 %v1834_v12  ;;  %v484_v12 = vcvt.f32.s32 %v1846_v58  ;;  %v604_v58 = vld [vmem:[#allocation3 + $0x58] sm:$0xff]  ;;  %vm918_vm14 = vcmask 654912  }
 0x241   :  { %815 = vperm.xlu1 %1194, %v776_v16   ;;  %v359_v37 = vshll.u32 %v358_v57, 16  ;;  %v457_v57 = vshll.u32 %v456_v29, 16 }
 0x242   :  { %v1916_v36 = vpop.xlane.xlu1 %393  ;;  %v485_v63 = vshll.u32 %v484_v12, 16 }
 0x243   :  { %vm395_vm7 = vcmp.eq.f32.partialorder %v1799_v60, %v1916_v36  ;;  %v595_v60 = vld [vmem:[#allocation3 + $0x10] sm:$0xff] }
 0x244   :  { %v396_v49 = vsel %vm395_vm7, %v391_v54, inf  ;;  %v345_v54 = vshll.u32 %v344_v3, 16  ;;  %vm925_vm7 = vcmask 720512  }
 0x245   :  { %818 = vperm.xlu1 %1194, %v777_v46   ;;  %v331_v46 = vshll.u32 %v330_v59, 16 }
 0x246   :  { %v1926_v17 = vpop.xlane.xlu1 %505 }
 0x256   :  { %806 = vperm.xlu0 %1193, %v773_v22  }
 0x25a   :  { %833 = vperm.xlu0 %1193, %v782_v52  }
 0x269   :  { %425 = vmin.xlane.f32.xlu1 %v424_v1 }
 0x26d   :  { %537 = vmin.xlane.f32.xlu1 %v536_v10 }
 0x271   :  { %397 = vmin.xlane.f32.xlu1 %v396_v49 }
 0x282   :  { %821 = vperm.xlu1 %1194, %v778_v21  }
 0x291   :  { %v356_v51 = vpop.xlane.xlu0 %355 }
 0x292   :  { %v357_v44 = vcvt.f32.s32 %v356_v51 }
 0x294   :  { %v360_v16 = vadd.s32 %v359_v37, %v357_v44  ;;  %v442_v37 = vcvt.f32.s32 %v1843_v26  ;;  %v768_v44 = vld [vmem:[#allocation2 + $0x58] sm:$0xff]  ;;  %v769_v26 = vld [vmem:[#allocation2 + $0x60] sm:$0xff] }
 0x295   :  { %v328_v14 = vpop.xlane.xlu1 %327 }
 0x296   :  { %v611_v23 = vsel %vm579_vm2, %v360_v16, %v595_v60  ;;  %v329_v4 = vcvt.f32.s32 %v328_v14  ;;  %vm507_vm2 = vcmp.eq.f32.partialorder %v1806_v15, %v1926_v17  ;;  %v471_v16 = vshll.u32 %v470_v25, 16 }
 0x297   :  { %628 = vst.msk [vmem:[#allocation3 + $0x10] sm:$0xff] %vm51_vm1, %v611_v23  ;;  %v508_v27 = vsel %vm507_vm2, %v503_v19, inf  ;;  %v428_v14 = vcvt.f32.s32 %v1906_v40  ;;  %vm932_vm2 = vcmask 786112  }
 0x298   :  { %v332_v22 = vadd.s32 %v331_v46, %v329_v4  ;;  %v443_v4 = vshll.u32 %v442_v37, 16 }
 0x299   :  { %v370_v24 = vpop.xlane.xlu1 %369 }
 0x29a   :  { %v609_v52 = vsel %vm577_vm5, %v332_v22, %v593_v6  ;;  %v371_v45 = vcvt.f32.s32 %v370_v24  ;;  %v414_v6 = vcvt.f32.s32 %v1855_v2 }
 0x29b   :  { %626 = vst.msk [vmem:[#allocation3] sm:$0xff] %vm51_vm1, %v609_v52 }
 0x29c   :  { %v374_v28 = vadd.s32 %v373_v7, %v371_v45 }
 0x29d   :  { %v482_v61 = vpop.xlane.xlu1 %481 }
 0x29e   :  { %v612_v1 = vsel %vm580_vm6, %v374_v28, %v596_v33  ;;  %v483_v38 = vcvt.f32.s32 %v482_v61  ;;  %v415_v33 = vshll.u32 %v414_v6, 16  ;;  %v526_v28 = vcvt.f32.s32 %v1883_v48 }
 0x29f   :  { %629 = vst.msk [vmem:[#allocation3 + $0x18] sm:$0xff] %vm51_vm1, %v612_v1  ;;  %v599_v1 = vld [vmem:[#allocation3 + $0x30] sm:$0xff]  ;;  %v871_v61 = vadd.s32 4294967272, %v1446_v62  ;;  %vm862_vm6 = vcmask 130112  }
 0x2a0   :  { %v486_v5 = vadd.s32 %v485_v63, %v483_v38  ;;  %v527_v48 = vshll.u32 %v526_v28, 16  ;;  %v966_v28 = vld [vmem:[#allocation3 + $0x10] sm:$0xff] }
 0x2a1   :  { %v342_v10 = vpop.xlane.xlu1 %341 }
 0x2a2   :  { %v620_v49 = vsel %vm588_vm15, %v486_v5, %v604_v58  ;;  %v343_v31 = vcvt.f32.s32 %v342_v10  ;;  %v763_v58 = vld [vmem:[#allocation2 + $0x30] sm:$0xff] }
 0x2a3   :  { %637 = vst.msk [vmem:[#allocation3 + $0x58] sm:$0xff] %vm51_vm1, %v620_v49  ;;  %v779_v29 = vadd.f32 %v763_v58, %v1921_v30 }
 0x2a4   :  { %v346_v32 = vadd.s32 %v345_v54, %v343_v31  ;;  %v386_v54 = vcvt.f32.s32 %v1860_v20 }
 0x2a5   :  { %v454_v21 = vpop.xlane.xlu1 %453 }
 0x2a6   :  { %v610_v51 = vsel %vm578_vm13, %v346_v32, %v594_v9  ;;  %v455_v43 = vcvt.f32.s32 %v454_v21  ;;  %509 = vmin.xlane.f32.xlu1 %v508_v27  ;;  %v967_v12 = vld [vmem:[#allocation3 + $0x18] sm:$0xff]  ;;  %v607_v32 = vld [vmem:[#allocation3 + $0x70] sm:$0xff]  ;;  %vm883_vm13 = vcmask 326912  }
 0x2a7   :  { %627 = vst.msk [vmem:[#allocation3 + $0x8] sm:$0xff] %vm51_vm1, %v610_v51  ;;  %v764_v27 = vld [vmem:[#allocation2 + $0x38] sm:$0xff]  ;;  %v387_v51 = vshll.u32 %v386_v54, 16 }
 0x2a8   :  { %v458_v15 = vadd.s32 %v457_v57, %v455_v43  ;;  %v780_v25 = vadd.f32 %v764_v27, %v1904_v42 }
 0x2a9   :  { %v744_v59 = vpop.xlane.xlu1 %743  ;;  %v468_v60 = vpop.xlane.xlu0 %467 }
 0x2aa   :  { %v618_v18 = vsel %vm586_vm11, %v458_v15, %v602_v50  ;;  %v784_v56 = vadd.f32 %v768_v44, %v744_v59  ;;  %v469_v46 = vcvt.f32.s32 %v468_v60  ;;  %v975_v38 = vld [vmem:[#allocation3 + $0x58] sm:$0xff]  ;;  %v597_v15 = vld [vmem:[#allocation3 + $0x20] sm:$0xff]  ;;  %vm876_vm11 = vcmask 261312  }
 0x2ab   :  { %635 = vst.msk [vmem:[#allocation3 + $0x48] sm:$0xff] %vm51_vm1, %v618_v18  ;;  %v765_v59 = vld [vmem:[#allocation2 + $0x40] sm:$0xff] }
 0x2ac   :  { %v472_v41 = vadd.s32 %v471_v16, %v469_v46  ;;  %839 = vperm.xlu0 %1193, %v784_v56   ;;  %v781_v60 = vadd.f32 %v765_v59, %v1923_v55  ;;  %v498_v16 = vcvt.f32.s32 %v1875_v11  ;;  %v2228_v11 = vld [vmem:[#allocation30_spill] sm:$0xff] }
 0x2ad   :  { %v440_v23 = vpop.xlane.xlu0 %439  ;;  %v1972_v0 = vpop.xlane.xlu1 %749 }
 0x2ae   :  { %v619_v24 = vsel %vm587_vm3, %v472_v41, %v603_v35  ;;  %v441_v7 = vcvt.f32.s32 %v440_v23  ;;  %v965_v21 = vld [vmem:[#allocation3 + $0x8] sm:$0xff]  ;;  %v499_v41 = vshll.u32 %v498_v16, 16  ;;  %vm897_vm3 = vcmask 458112  }
 0x2af   :  { %636 = vst.msk [vmem:[#allocation3 + $0x50] sm:$0xff] %vm51_vm1, %v619_v24  ;;  %v2229_v24 = vld [vmem:[#allocation29_spill] sm:$0xff] }
 0x2b0   :  { %v444_v52 = vadd.s32 %v443_v4, %v441_v7  ;;  %990 = vperm.xlu0 %1193, %v967_v12   ;;  %v605_v4 = vld [vmem:[#allocation3 + $0x60] sm:$0xff]  ;;  %vm2230_vm5 = vcmp.gt.f32.partialorder %v2228_v11, %v2229_v24  ;;  %v2231_v12 = vlaneseq }
 0x2b1   :  { %v412_v45 = vpop.xlane.xlu0 %411  ;;  %v1981_v43 = vpop.xlane.xlu1 %755 }
 0x2b2   :  { %v617_v3 = vsel %vm585_vm9, %v444_v52, %v601_v34  ;;  %v413_v2 = vcvt.f32.s32 %v412_v45  ;;  %v973_v37 = vld [vmem:[#allocation3 + $0x48] sm:$0xff]  ;;  %v1998_v52 = vshrl.u32 %v2231_v12, 7  ;;  %v857_v45 = vadd.s32 4294967288, %v1446_v62 }
 0x2b3   :  { %634 = vst.msk [vmem:[#allocation3 + $0x40] sm:$0xff] %vm51_vm1, %v617_v3  ;;  %v878_v3 = vadd.s32 4294967264, %v1446_v62  ;;  %vm869_vm9 = vcmask 195712   ;;  %v2237_v12 = vld [vmem:[#allocation27_spill] sm:$0xff] }
 0x2b4   :  { %v416_v5 = vadd.s32 %v415_v33, %v413_v2  ;;  %1014 = vperm.xlu0 %1193, %v975_v38   ;;  %v864_v33 = vadd.s32 4294967280, %v1446_v62  ;;  %v2009_v58 = vsub.s32 %v1446_v62, %v1998_v52 }
 0x2b5   :  { %v524_v10 = vpop.xlane.xlu0 %523  ;;  %v810_v53 = vpop.permute.xlu1 %809  ;;  %v2018_v54 = vsub.s32 %v878_v3, %v1998_v52 }
 0x2b6   :  { %v615_v9 = vsel %vm583_vm4, %v416_v5, %v599_v1  ;;  %v525_v19 = vcvt.f32.s32 %v524_v10  ;;  %v2005_v1 = vsub.s32 %v857_v45, %v1998_v52  ;;  %v2012_v5 = vsub.s32 %v864_v33, %v1998_v52 }
 0x2b7   :  { %632 = vst.msk [vmem:[#allocation3 + $0x30] sm:$0xff] %vm51_vm1, %v615_v9  ;;  %824 = vperm.xlu1 %1194, %v779_v29   ;;  %v974_v29 = vld [vmem:[#allocation3 + $0x50] sm:$0xff]  ;;  %v2015_v10 = vsub.s32 %v871_v61, %v1998_v52 }
 0x2b8   :  { %v528_v57 = vadd.s32 %v527_v48, %v525_v19  ;;  %984 = vperm.xlu0 %1193, %v965_v21   ;;  %v861_v49 = vrot.slane %v810_v53, %v2005_v1  ;;  %v540_v53 = vcvt.f32.s32 %v1909_v13  ;;  %v2234_v13 = vld [vmem:[#allocation24_spill] sm:$0xff] }
 0x2b9   :  { %v384_v30 = vpop.xlane.xlu0 %383  ;;  %v813_v22 = vpop.permute.xlu1 %812  ;;  %vm2235_vm4 = vcmp.gt.f32.partialorder %v1638_v47, %v2234_v13  ;;  %v512_v47 = vcvt.f32.s32 %v1926_v17 }
 0x2ba   :  { %v623_v20 = vsel %vm591_vm12, %v528_v57, %v607_v32  ;;  %v385_v50 = vcvt.f32.s32 %v384_v30  ;;  %v868_v19 = vrot.slane %v813_v22, %v2012_v5  ;;  %v964_v32 = vld [vmem:[#allocation3] sm:$0xff] }
 0x2bb   :  { %640 = vst.msk [vmem:[#allocation3 + $0x70] sm:$0xff] %vm51_vm1, %v623_v20  ;;  %827 = vperm.xlu1 %1194, %v780_v25   ;;  %v513_v3 = vshll.u32 %v512_v47, 16 }
 0x2bc   :  { %v388_v44 = vadd.s32 %v387_v51, %v385_v50  ;;  %1008 = vperm.xlu0 %1193, %v973_v37   ;;  %v972_v51 = vld [vmem:[#allocation3 + $0x40] sm:$0xff]  ;;  %v770_v37 = vld [vmem:[#allocation2 + $0x68] sm:$0xff] }
 0x2bd   :  { %v741_v42 = vpop.xlane.xlu0 %740  ;;  %v816_v63 = vpop.permute.xlu1 %815  ;;  %v786_v59 = vadd.f32 %v770_v37, %v1972_v0  ;;  %v400_v0 = vcvt.f32.s32 %v1916_v36 }
 0x2be   :  { %v613_v56 = vsel %vm581_vm10, %v388_v44, %v597_v15  ;;  %v783_v46 = vadd.f32 %v767_v8, %v741_v42  ;;  %v875_v21 = vrot.slane %v816_v63, %v2015_v10  ;;  %v970_v50 = vld [vmem:[#allocation3 + $0x30] sm:$0xff]  ;;  %v772_v42 = vld [vmem:[#allocation2 + $0x78] sm:$0xff] }
 0x2bf   :  { %630 = vst.msk [vmem:[#allocation3 + $0x20] sm:$0xff] %vm51_vm1, %v613_v56  ;;  %830 = vperm.xlu1 %1194, %v781_v60   ;;  %v771_v44 = vld [vmem:[#allocation2 + $0x70] sm:$0xff]  ;;  %v788_v16 = vadd.f32 %v772_v42, %v1981_v43  ;;  %v429_v56 = vshll.u32 %v428_v14, 16  ;;  %v608_v43 = vld [vmem:[#allocation3 + $0x78] sm:$0xff]  ;;  %v401_v22 = vshll.u32 %v400_v0, 16 }
 0x2c1   :  { %v496_v35 = vpop.xlane.xlu0 %495  ;;  %v819_v31 = vpop.permute.xlu1 %818 }
 0x2c2   :  { %v497_v23 = vcvt.f32.s32 %v496_v35  ;;  %v882_v57 = vrot.slane %v819_v31, %v2018_v54  ;;  %v2240_v31 = vld [vmem:[#allocation31_spill] sm:$0xff] }
 0x2c3   :  { %836 = vperm.xlu1 %1194, %v783_v46   ;;  %v600_v46 = vld [vmem:[#allocation3 + $0x38] sm:$0xff] }
 0x2c4   :  { %v500_v6 = vadd.s32 %v499_v41, %v497_v23  ;;  %v541_v23 = vshll.u32 %v540_v53, 16 }
 0x2c5   :  { %v747_v55 = vpop.xlane.xlu0 %746 }
 0x2c6   :  { %v621_v7 = vsel %vm2230_vm5, %v500_v6, %v605_v4  ;;  %v785_v34 = vadd.f32 %v769_v26, %v747_v55  ;;  %v968_v15 = vld [vmem:[#allocation3 + $0x20] sm:$0xff]  ;;  %vm939_vm5 = vcmask 851712  }
 0x2c7   :  { %638 = vst.msk [vmem:[#allocation3 + $0x60] sm:$0xff] %vm51_vm1, %v621_v7  ;;  %v2232_v4 = vld [vmem:[#allocation21_spill] sm:$0xff]  ;;  %v598_v7 = vld [vmem:[#allocation3 + $0x28] sm:$0xff] }
 0x2c8   :  { %842 = vperm.xlu1 %1194, %v785_v34   ;;  %vm2233_vm15 = vcmp.gt.f32.partialorder %v1600_v39, %v2232_v4  ;;  %v2236_v34 = vld [vmem:[#allocation28_spill] sm:$0xff] }
 0x2c9   :  { %v753_v2 = vpop.xlane.xlu0 %752  ;;  %vm2238_vm10 = vcmp.gt.f32.partialorder %v2236_v34, %v2237_v12  ;;  %v934_v34 = vadd.s32 4294967200, %v1446_v62 }
 0x2ca   :  { %v787_v60 = vadd.f32 %v771_v44, %v753_v2 }
 0x2cc   :  { %987 = vperm.xlu1 %1194, %v966_v28   ;;  %v978_v28 = vld [vmem:[#allocation3 + $0x70] sm:$0xff] }
 0x2ce   :  { %v976_v38 = vld [vmem:[#allocation3 + $0x60] sm:$0xff] }
 0x2cf   :  { %1017 = vperm.xlu0 %1193, %v976_v38   ;;  %v606_v38 = vld [vmem:[#allocation3 + $0x68] sm:$0xff] }
 0x2d0   :  { %1011 = vperm.xlu1 %1194, %v974_v29  }
 0x2d1   :  { %v807_v48 = vpop.permute.xlu0 %806 }
 0x2d2   :  { %v856_v9 = vrot.slane %v807_v48, %v2009_v58 }
 0x2d4   :  { %v863_v27 = vsel %vm862_vm6, %v861_v49, %v856_v9  ;;  %981 = vperm.xlu1 %1194, %v964_v32   ;;  %v2239_v49 = vld [vmem:[#allocation32_spill] sm:$0xff] }
 0x2d5   :  { %v870_v25 = vsel %vm869_vm9, %v868_v19, %v863_v27  ;;  %vm2241_vm12 = vcmp.gt.f32.partialorder %v2239_v49, %v2240_v31  ;;  %v2053_v19 = vpop.permute.xlu0 %833  ;;  %v955_v49 = vadd.s32 4294967176, %v1446_v62 }
 0x2d6   :  { %v877_v30 = vsel %vm876_vm11, %v875_v21, %v870_v25 }
 0x2d7   :  { %v2029_v20 = vsel %vm883_vm13, %v882_v57, %v877_v30 }
 0x2d8   :  { %1005 = vperm.xlu1 %1194, %v972_v51  }
 0x2dc   :  { %999 = vperm.xlu1 %1194, %v970_v50   ;;  %v920_v50 = vadd.s32 4294967216, %v1446_v62 }
 0x2e0   :  { %993 = vperm.xlu1 %1194, %v968_v15  }
 0x2e4   :  { %845 = vperm.xlu1 %1194, %v786_v59   ;;  %v2065_v59 = vsub.s32 %v920_v50, %v1998_v52 }
 0x2e8   :  { %848 = vperm.xlu1 %1194, %v787_v60  }
 0x2ec   :  { %851 = vperm.xlu1 %1194, %v788_v16   ;;  %v906_v16 = vadd.s32 4294967232, %v1446_v62 }
 0x2f2   :  { %v426_v18 = vpop.xlane.xlu1 %425 }
 0x2f3   :  { %v427_v8 = vcvt.f32.s32 %v426_v18  ;;  %v885_v18 = vadd.s32 4294967256, %v1446_v62 }
 0x2f5   :  { %v430_v35 = vadd.s32 %v429_v56, %v427_v8  ;;  %v892_v8 = vadd.s32 4294967248, %v1446_v62 }
 0x2f6   :  { %v538_v41 = vpop.xlane.xlu1 %537 }
 0x2f7   :  { %v616_v6 = vsel %vm2233_vm15, %v430_v35, %v600_v46  ;;  %v539_v55 = vcvt.f32.s32 %v538_v41  ;;  %v899_v35 = vadd.s32 4294967240, %v1446_v62  ;;  %v2079_v41 = vsub.s32 %v906_v16, %v1998_v52 }
 0x2f8   :  { %633 = vst.msk [vmem:[#allocation3 + $0x38] sm:$0xff] %vm51_vm1, %v616_v6  ;;  %v2086_v6 = vsub.s32 %v885_v18, %v1998_v52 }
 0x2f9   :  { %v542_v40 = vadd.s32 %v541_v23, %v539_v55  ;;  %v2095_v55 = vsub.s32 %v899_v35, %v1998_v52 }
 0x2fa   :  { %v398_v26 = vpop.xlane.xlu1 %397 }
 0x2fb   :  { %v624_v11 = vsel %vm2235_vm4, %v542_v40, %v608_v43  ;;  %v399_v24 = vcvt.f32.s32 %v398_v26 }
 0x2fc   :  { %641 = vst.msk [vmem:[#allocation3 + $0x78] sm:$0xff] %vm51_vm1, %v624_v11  ;;  %v927_v11 = vadd.s32 4294967208, %v1446_v62 }
 0x2fd   :  { %v402_v36 = vadd.s32 %v401_v22, %v399_v24 }
 0x2fe   :  { %v822_v61 = vpop.permute.xlu1 %821  ;;  %v2119_v47 = vsub.s32 %v927_v11, %v1998_v52 }
 0x2ff   :  { %v614_v39 = vsel %vm2238_vm10, %v402_v36, %v598_v7  ;;  %v971_v45 = vld [vmem:[#allocation3 + $0x38] sm:$0xff]  ;;  %v889_v40 = vrot.slane %v822_v61, %v2086_v6 }
 0x300   :  { %631 = vst.msk [vmem:[#allocation3 + $0x28] sm:$0xff] %vm51_vm1, %v614_v39  ;;  %1002 = vperm.xlu0 %1193, %v971_v45  }
 0x303   :  { %v979_v25 = vld [vmem:[#allocation3 + $0x78] sm:$0xff] }
 0x307   :  { %v969_v33 = vld [vmem:[#allocation3 + $0x28] sm:$0xff] }
 0x308   :  { %996 = vperm.xlu0 %1193, %v969_v33   ;;  %v941_v33 = vadd.s32 4294967192, %v1446_v62 }
 0x30c   :  { %1023 = vperm.xlu0 %1193, %v978_v28  }
 0x327   :  { %v2055_v21 = vpop.permute.xlu0 %839 }
 0x32b   :  { %v991_v30 = vpop.permute.xlu0 %990 }
 0x32c   :  { %v1045_v7 = vrot.slane %v991_v30, %v2015_v10  ;;  %v948_v10 = vadd.s32 4294967184, %v1446_v62 }
 0x32e   :  { %v951_v31 = vsub.s32 %v948_v10, %v1998_v52 }
 0x32f   :  { %v510_v63 = vpop.xlane.xlu1 %509  ;;  %v2062_v15 = vpop.permute.xlu0 %1014 }
 0x330   :  { %v511_v2 = vcvt.f32.s32 %v510_v63 }
 0x332   :  { %v514_v29 = vadd.s32 %v513_v3, %v511_v2  ;;  %v937_v2 = vsub.s32 %v934_v34, %v1998_v52 }
 0x333   :  { %v825_v48 = vpop.permute.xlu1 %824  ;;  %v985_v42 = vpop.permute.xlu0 %984 }
 0x334   :  { %v622_v9 = vsel %vm2241_vm12, %v514_v29, %v606_v38  ;;  %v1035_v56 = vrot.slane %v985_v42, %v2005_v1 }
 0x335   :  { %639 = vst.msk [vmem:[#allocation3 + $0x68] sm:$0xff] %vm51_vm1, %v622_v9  ;;  %vm890_vm1 = vcmask 392512  }
 0x336   :  { %v891_v39 = vsel %vm890_vm1, %v889_v40, %v2029_v20 }
 0x337   :  { %v828_v32 = vpop.permute.xlu1 %827 }
 0x338   :  { %v903_v24 = vrot.slane %v828_v32, %v2095_v55 }
 0x33b   :  { %v831_v27 = vpop.permute.xlu1 %830 }
 0x33c   :  { %v977_v57 = vld [vmem:[#allocation3 + $0x68] sm:$0xff]  ;;  %v910_v36 = vrot.slane %v831_v27, %v2079_v41 }
 0x33d   :  { %1020 = vperm.xlu0 %1193, %v977_v57  }
 0x33f   :  { %v2057_v17 = vpop.permute.xlu1 %836 }
 0x341   :  { %1026 = vperm.xlu0 %1193, %v979_v25   ;;  %v958_v25 = vsub.s32 %v955_v49, %v1998_v52 }
 0x343   :  { %v2059_v51 = vpop.permute.xlu1 %842 }
 0x344   :  { %v938_v27 = vrot.slane %v2059_v51, %v937_v2 }
 0x347   :  { %v988_v37 = vpop.permute.xlu1 %987 }
 0x348   :  { %v1040_v46 = vrot.slane %v988_v37, %v2012_v5  ;;  %v913_v5 = vadd.s32 4294967224, %v1446_v62 }
 0x34a   :  { %v2104_v13 = vsub.s32 %v913_v5, %v1998_v52 }
 0x34b   :  { %v2067_v44 = vpop.permute.xlu1 %1011 }
 0x34c   :  { %v1080_v60 = vrot.slane %v2067_v44, %v2065_v59  ;;  %v917_v29 = vrot.slane %v2053_v19, %v2104_v13 }
 0x34f   :  { %v982_v14 = vpop.permute.xlu1 %981 }
 0x350   :  { %v1031_v53 = vrot.slane %v982_v14, %v2009_v58  ;;  %v2091_v58 = vsub.s32 %v892_v8, %v1998_v52 }
 0x352   :  { %v1036_v23 = vsel %vm862_vm6, %v1035_v56, %v1031_v53  ;;  %v896_v22 = vrot.slane %v825_v48, %v2091_v58  ;;  %v944_v48 = vsub.s32 %v941_v33, %v1998_v52  ;;  %vm946_vm6 = vcmask 917312  }
 0x353   :  { %v1041_v0 = vsel %vm869_vm9, %v1040_v46, %v1036_v23  ;;  %v2083_v4 = vpop.permute.xlu1 %1005  ;;  %vm953_vm9 = vcmask 982912  }
 0x354   :  { %v1070_v1 = vrot.slane %v2083_v4, %v2079_v41  ;;  %v898_v28 = vsel %vm897_vm3, %v896_v22, %v891_v39  ;;  %v1046_v61 = vsel %vm876_vm11, %v1045_v7, %v1041_v0  ;;  %vm960_vm11 = vcmask 1048512  }
 0x355   :  { %v905_v63 = vsel %vm904_vm8, %v903_v24, %v898_v28 }
 0x356   :  { %v912_v20 = vsel %vm911_vm0, %v910_v36, %v905_v63 }
 0x357   :  { %v2097_v43 = vpop.permute.xlu1 %999  ;;  %v919_v9 = vsel %vm918_vm14, %v917_v29, %v912_v20 }
 0x358   :  { %v1060_v26 = vrot.slane %v2097_v43, %v2091_v58 }
 0x35b   :  { %v994_v12 = vpop.permute.xlu1 %993 }
 0x35c   :  { %v1050_v45 = vrot.slane %v994_v12, %v2018_v54  ;;  %v924_v54 = vrot.slane %v2057_v17, %v2065_v59  ;;  %v931_v17 = vrot.slane %v2055_v21, %v2119_v47 }
 0x35e   :  { %v1051_v3 = vsel %vm883_vm13, %v1050_v45, %v1046_v61  ;;  %v926_v32 = vsel %vm925_vm7, %v924_v54, %v919_v9 }
 0x35f   :  { %v846_v38 = vpop.permute.xlu1 %845  ;;  %v933_v62 = vsel %vm932_vm2, %v931_v17, %v926_v32 }
 0x360   :  { %v945_v19 = vrot.slane %v846_v38, %v944_v48  ;;  %v940_v50 = vsel %vm939_vm5, %v938_v27, %v933_v62 }
 0x362   :  { %v947_v51 = vsel %vm946_vm6, %v945_v19, %v940_v50 }
 0x363   :  { %v849_v57 = vpop.permute.xlu1 %848 }
 0x364   :  { %v952_v30 = vrot.slane %v849_v57, %v951_v31 }
 0x366   :  { %v954_v21 = vsel %vm953_vm9, %v952_v30, %v947_v51 }
 0x367   :  { %v852_v37 = vpop.permute.xlu1 %851 }
 0x368   :  { %v959_v42 = vrot.slane %v852_v37, %v958_v25 }
 0x36a   :  { %v961_v16 = vsel %vm960_vm11, %v959_v42, %v954_v21 }
 0x36b   :  { %963 = vst [vmem:[#allocation9] sm:$0x1] %v961_v16 }
 0x36c   :  { %1248 = shalt.err (!%p1245_p0)
}
 0x36d   :  { %1117 = dma.vmem_to_hbm [thread:$0]  %s1115_s30, 16, %s2177_s3, [#allocation6]   ;;  %v1009_v52 = vpop.permute.xlu0 %1008 }
 0x36e   :  { %v1075_v23 = vrot.slane %v1009_v52, %v2104_v13  ;;  %s1294_s3 = smov [#allocation10]  }
 0x36f   :  { %s1124_s9 = sshll.u32 %s1294_s3, 4  ;;  %s1125_s9 = int_to_ptr.vmem [resolvable:$true] %s1124_s9 }
 0x370   :  { %s1257_s10 = scalar_lea.vmem %s1125_s9, 16  ;;  %s1261_s11 = scalar_lea.vmem %s1125_s9, 32 }
 0x371   :  { %v1018_v14 = vpop.permute.xlu0 %1017  ;;  %p1258_p1 = scmp.ne.s32.totalorder %s1125_s9, %s1257_s10  ;;  %p1262_p2 = scmp.lt.s32.totalorder %s1125_s9, %s1125_s9 }
 0x372   :  { %v1090_v40 = vrot.slane %v1018_v14, %v937_v2  ;;  %p1263_p3 = scmp.lt.s32.totalorder %s1261_s11, %s1257_s10 }
 0x374   :  { %p1264_p4 = por %p1263_p3, %p1262_p2 }
 0x376   :  { %p1265_p5 = pnand %p1264_p4, %p1258_p1 }
 0x37b   :  { %v1003_v18 = vpop.permute.xlu0 %1002 }
 0x37c   :  { %v1065_v8 = vrot.slane %v1003_v18, %v2095_v55 }
 0x383   :  { %v997_v56 = vpop.permute.xlu0 %996 }
 0x384   :  { %v1055_v53 = vrot.slane %v997_v56, %v2086_v6  ;;  %v1085_v6 = vrot.slane %v2062_v15, %v2119_v47 }
 0x386   :  { %v1056_v46 = vsel %vm890_vm1, %v1055_v53, %v1051_v3 }
 0x387   :  { %v1061_v35 = vsel %vm897_vm3, %v1060_v26, %v1056_v46  ;;  %v1024_v22 = vpop.permute.xlu0 %1023 }
 0x388   :  { %v1066_v0 = vsel %vm904_vm8, %v1065_v8, %v1061_v35  ;;  %v1100_v4 = vrot.slane %v1024_v22, %v951_v31 }
 0x389   :  { %v1071_v5 = vsel %vm911_vm0, %v1070_v1, %v1066_v0 }
 0x38a   :  { %v1076_v55 = vsel %vm918_vm14, %v1075_v23, %v1071_v5 }
 0x38b   :  { %v1081_v58 = vsel %vm925_vm7, %v1080_v60, %v1076_v55 }
 0x38c   :  { %v1086_v43 = vsel %vm932_vm2, %v1085_v6, %v1081_v58 }
 0x38d   :  { %v1091_v26 = vsel %vm939_vm5, %v1090_v40, %v1086_v43 }
 0x3b8   :  { %v1021_v13 = vpop.permute.xlu0 %1020 }
 0x3b9   :  { %v1095_v41 = vrot.slane %v1021_v13, %v944_v48 }
 0x3bb   :  { %v1096_v1 = vsel %vm946_vm6, %v1095_v41, %v1091_v26 }
 0x3bc   :  { %v1027_v15 = vpop.permute.xlu0 %1026  ;;  %v1101_v11 = vsel %vm953_vm9, %v1100_v4, %v1096_v1 }
 0x3bd   :  { %v1105_v24 = vrot.slane %v1027_v15, %v958_v25 }
 0x3bf   :  { %v1106_v59 = vsel %vm960_vm11, %v1105_v24, %v1101_v11 }
 0x3c0   :  { %1107 = vst [vmem:[#allocation10] sm:$0x1] %v1106_v59 }
 0x3c1   :  { %1268 = shalt.err (!%p1265_p5)
}
 0x3c2   :  { %1127 = dma.vmem_to_hbm [thread:$0]  %s1125_s9, 16, %s2178_s4, [#allocation11]  }
 0x3c3   :  { %1281 = dma.done.wait [#allocation6], 16  }
 0x3c4   :  { %1282 = vsyncadd [#allocation6], 4294967280 }
 0x3c5   :  { %1283 = dma.done.wait [#allocation11], 16  }
 0x3c6   :  { %1284 = vsyncadd [#allocation11], 4294967280 }
 0x3c7   :  { %1134 = vsyncpa [#allocation5], 1 }
 0x3c8   :  { %1135 = vsyncpa [#allocation8], 1 }
 0x3c9   :  { %1136 = vsyncpa [#allocation6], 1 }
 0x3ca   :  { %1137 = vsyncpa [#allocation11], 1 }

</bundles_post_ra>
